<compile_context>
chip_gen: v7x
topology: tpu7x:2x2x1
jax: 0.10.0
libtpu: 0.0.40
codegen_flags: <defaults>
</compile_context>

<pallas_src>
import functools
import numpy as np
import jax
import jax.numpy as jnp
from jax.experimental import pallas as pl
from jax.experimental.pallas import tpu as pltpu

KSIZE = 3
GROUPS = 4
EPS = 1e-5
_SMALL_C_MXU_THRESHOLD = 16   # use VPU broadcast-FMAs for the 1x1 conv when C <= this


def _dw_gn_pw_kernel(x_ref, wdw_ref, bdw_ref, gamma_ref, gmat_ref, wpw_ref,
                     b0_ref, masks_ref, o_ref, *, W, use_mxu):
    # x_ref   : (NB, C, HW)   NB batch elems, NCHW with spatial flattened onto lanes
    # wdw_ref : (9, C, 1)     depthwise 3x3 weights, tap index t = ki*3 + kj
    # bdw_ref : (C, 1)        depthwise bias
    # gamma_ref: (1, C)       GroupNorm gamma (row-oriented)
    # gmat_ref: (C, C)        group-average matrix, pre-scaled by 1/(group_size*HW)
    # wpw_ref : (Cout, C)     1x1 conv weights
    # b0_ref  : (Cout, 1)     Wpw @ beta + bpw (host-precomputed, data independent)
    # masks_ref: (9, 1, HW)   per-tap validity masks (1.0 inside image, 0.0 where zero-padding applies)
    # o_ref   : (NB, Cout, HW)
    NB, C, HW = x_ref.shape
    Cout = o_ref.shape[1]

    gamma = gamma_ref[...]                                    # (1, C)
    gmat = gmat_ref[...]                                      # (C, C)
    wpw = wpw_ref[...]                                        # (Cout, C)
    b0 = b0_ref[...]                                          # (Cout, 1)
    bdw = bdw_ref[...]                                        # (C, 1)
    wtap = [wdw_ref[t] for t in range(KSIZE * KSIZE)]         # 9 x (C, 1)

    for b in range(NB):           # static unroll over batch elements in this block
        x = x_ref[b]              # (C, HW)  f32, lane-dense

        # ---- depthwise 3x3 conv, padding=1 via 8 masked lane rotations (XLU) + center tap ----
        acc = x * wtap[4]                                     # center tap, no mask
        for ki in range(KSIZE):
            for kj in range(KSIZE):
                di, dj = ki - 1, kj - 1
                if di == 0 and dj == 0:
                    continue
                t = ki * KSIZE + kj
                shift = (-(di * W + dj)) % HW                 # shifted[i] = x[i + di*W + dj]
                shifted = pltpu.roll(x, shift=shift, axis=1)
                acc = acc + (shifted * masks_ref[t]) * wtap[t]
        acc = acc + bdw

        # ---- GroupNorm(4) statistics (one-pass E[x^2]-E[x]^2; fine for conv-scale activations) ----
        ch_sum = jnp.sum(acc, axis=1, keepdims=True)          # (C, 1)
        ch_sq = jnp.sum(acc * acc, axis=1, keepdims=True)     # (C, 1)
        # group-average AND move to lane-oriented rows in one broadcast-mul + sublane reduce
        mean_row = jnp.sum(gmat * ch_sum, axis=0, keepdims=True)    # (1, C)
        ex2_row = jnp.sum(gmat * ch_sq, axis=0, keepdims=True)      # (1, C)
        inv_row = jax.lax.rsqrt(ex2_row - mean_row * mean_row + EPS)
        s_row = inv_row * gamma                                      # (1, C)

        # ---- GN affine + mean folded into the 1x1 conv (diagonal fold; no (C, HW) scale mul) ----
        w_s = wpw * s_row                                            # (Cout, C)
        b_eff = b0 - jnp.sum(w_s * mean_row, axis=1, keepdims=True)  # (Cout, 1)

        if use_mxu:
            out = jnp.dot(w_s, acc, preferred_element_type=jnp.float32) + b_eff
        else:
            # tiny C: MXU contraction dim is badly under-utilized and the matmul is latency-bound;
            # a handful of VPU broadcast-FMAs is cheaper.
            out = b_eff + w_s[:, 0:1] * acc[0:1, :]
            for c in range(1, C):
                out = out + w_s[:, c:c + 1] * acc[c:c + 1, :]
        o_ref[b] = out.astype(o_ref.dtype)                    # lane-dense (multiple-of-128) store


def _batch_block(N, C, Cout, HW):
    """Fatter grid steps when the per-image working set is tiny (v5e/v6e grids are serial loops),
    while keeping >= 2 grid steps when N allows so both v7x TensorCores get work."""
    per_image = (C + Cout) * HW * 4
    nb = 1
    for cand in range(2, min(N, 8) + 1):
        if N % cand == 0 and N // cand >= 2 and cand * per_image <= (1 << 20):
            nb = cand
    return nb


def depthwise_conv2d_block(x_nchw, conv1_w, conv1_b, gn_w, gn_b, conv2_w, conv2_b):
    """Pallas implementation of DepthWiseConv2d.forward (dw 3x3 -> GroupNorm(4) -> 1x1). NCHW i/o."""
    N, C, H, W = x_nchw.shape
    Cout = conv2_w.shape[0]
    cg = C // GROUPS
    HW = H * W

    # glue: metadata-only reshapes, no transposes / pads on the big tensor
    x_flat = x_nchw.reshape(N, C, HW).astype(jnp.float32)
    w_dw = conv1_w.reshape(C, KSIZE * KSIZE).T.reshape(KSIZE * KSIZE, C, 1).astype(jnp.float32)
    b_dw = conv1_b.reshape(C, 1).astype(jnp.float32)
    gamma_row = gn_w.reshape(1, C).astype(jnp.float32)
    w_pw = conv2_w[:, :, 0, 0].astype(jnp.float32)                       # (Cout, C)
    # GN shift folded host-side: b0 = Wpw @ beta + bpw
    b0 = (w_pw @ gn_b.reshape(C, 1).astype(jnp.float32)
          + conv2_b.reshape(Cout, 1).astype(jnp.float32))

    # group-average matrix with 1/(cg*HW) folded in (symmetric)
    gids = np.arange(C) // cg
    gmat = jnp.asarray((gids[:, None] == gids[None, :]).astype(np.float32) / (cg * HW))

    # per-tap zero-padding masks, precomputed host-side (tap t = ki*3 + kj)
    h_id = np.arange(HW) // W
    w_id = np.arange(HW) % W
    masks_np = np.ones((KSIZE * KSIZE, 1, HW), np.float32)
    for ki in range(KSIZE):
        for kj in range(KSIZE):
            di, dj = ki - 1, kj - 1
            ok = np.ones(HW, np.bool_)
            if dj == -1:
                ok &= w_id >= 1
            elif dj == 1:
                ok &= w_id <= W - 2
            if di == -1:
                ok &= h_id >= 1
            elif di == 1:
                ok &= h_id <= H - 2
            masks_np[ki * KSIZE + kj, 0] = ok.astype(np.float32)
    masks = jnp.asarray(masks_np)

    NB = _batch_block(N, C, Cout, HW)
    use_mxu = C > _SMALL_C_MXU_THRESHOLD
    kernel = functools.partial(_dw_gn_pw_kernel, W=W, use_mxu=use_mxu)

    # TODO(synk): for production image sizes (e.g. C=128, 256x256) switch to a two-pass, H-halo-tiled
    # layout (rows on sublanes, W on lanes) so vertical taps become static sublane slices (2-XLU
    # v6e/v7x), blocks fit v7x's 64 MiB VMEM, the spatial axis becomes a second "parallel" grid dim,
    # and x/out can be staged in bf16 to halve HBM traffic.
    out_flat = pl.pallas_call(
        kernel,
        out_shape=jax.ShapeDtypeStruct((N, Cout, HW), jnp.float32),
        grid_spec=pltpu.PrefetchScalarGridSpec(
            num_scalar_prefetch=0,
            grid=(N // NB,),
            in_specs=[
                pl.BlockSpec((NB, C, HW), lambda n: (n, 0, 0)),
                pl.BlockSpec((KSIZE * KSIZE, C, 1), lambda n: (0, 0, 0)),
                pl.BlockSpec((C, 1), lambda n: (0, 0)),
                pl.BlockSpec((1, C), lambda n: (0, 0)),
                pl.BlockSpec((C, C), lambda n: (0, 0)),
                pl.BlockSpec((Cout, C), lambda n: (0, 0)),
                pl.BlockSpec((Cout, 1), lambda n: (0, 0)),
                pl.BlockSpec((KSIZE * KSIZE, 1, HW), lambda n: (0, 0, 0)),
            ],
            out_specs=pl.BlockSpec((NB, Cout, HW), lambda n: (n, 0, 0)),
        ),
        compiler_params=pltpu.CompilerParams(
            dimension_semantics=("parallel",),
            vmem_limit_bytes=32 * 1024 * 1024),
    )(x_flat, w_dw, b_dw, gamma_row, gmat, w_pw, b0, masks)

    # (N, Cout, H*W) -> (N, Cout, H, W) is already NCHW: free reshape, no transpose
    return out_flat.reshape(N, Cout, H, W)


def reference(x, conv1_w, conv1_b, gn_w, gn_b, conv2_w, conv2_b):
    """Pure-JAX reference matching the PyTorch module semantics (NCHW)."""
    N, C, H, W = x.shape
    y = jax.lax.conv_general_dilated(
        x, conv1_w, window_strides=(1, 1), padding=((1, 1), (1, 1)),
        dimension_numbers=('NCHW', 'OIHW', 'NCHW'), feature_group_count=C)
    y = y + conv1_b[None, :, None, None]
    yg = y.reshape(N, GROUPS, C // GROUPS, H, W)
    mean = yg.mean(axis=(2, 3, 4), keepdims=True)
    var = ((yg - mean) ** 2).mean(axis=(2, 3, 4), keepdims=True)
    yn = ((yg - mean) / jnp.sqrt(var + EPS)).reshape(N, C, H, W)
    yn = yn * gn_w[None, :, None, None] + gn_b[None, :, None, None]
    z = jnp.einsum('nchw,dc->ndhw', yn, conv2_w[:, :, 0, 0])
    z = z + conv2_b[None, :, None, None]
    return z


def _run_case(N, C_in, C_out, H, W):
    key = jax.random.PRNGKey(0)
    k = jax.random.split(key, 7)
    conv1_w = jax.random.uniform(k[0], (C_in, 1, KSIZE, KSIZE), minval=-0.3, maxval=0.3)
    conv1_b = jax.random.uniform(k[1], (C_in,), minval=-0.3, maxval=0.3)
    gn_w = 1.0 + 0.1 * jax.random.normal(k[2], (C_in,))
    gn_b = 0.1 * jax.random.normal(k[3], (C_in,))
    conv2_w = jax.random.uniform(k[4], (C_out, C_in, 1, 1), minval=-0.3, maxval=0.3)
    conv2_b = jax.random.uniform(k[5], (C_out,), minval=-0.3, maxval=0.3)
    x = jax.random.normal(k[6], (N, C_in, H, W), dtype=jnp.float32)

    out = jax.block_until_ready(
        depthwise_conv2d_block(x, conv1_w, conv1_b, gn_w, gn_b, conv2_w, conv2_b))
    ref = jax.block_until_ready(
        reference(x, conv1_w, conv1_b, gn_w, gn_b, conv2_w, conv2_b))
    assert out.shape == (N, C_out, H, W)
    err = float(np.abs(np.asarray(out) - np.asarray(ref)).max())
    assert np.allclose(np.asarray(out), np.asarray(ref), atol=1e-4, rtol=1e-4), err


if __name__ == "__main__":
    # primary case: dim_in=8 (divisible by the 4 GN groups); exercises the small-C VPU 1x1 path
    # and the 2-images-per-grid-step batching (grid still has 2 parallel steps for v7x megacore).
    _run_case(N=4, C_in=8, C_out=16, H=16, W=16)
    # secondary case: larger C exercises the MXU 1x1-conv path (NB=1).
    _run_case(N=2, C_in=32, C_out=8, H=16, W=16)
    print("KERNEL_OK")
</pallas_src>

<mosaic_0001>
module attributes {stable_mosaic.version = 11 : i64} {
  func.func @_dw_gn_pw_kernel(%arg0: i32, %arg1: memref<2x8x256xf32, #tpu.memory_space<vmem>>, %arg2: memref<9x8x1xf32, #tpu.memory_space<vmem>>, %arg3: memref<8x1xf32, #tpu.memory_space<vmem>>, %arg4: memref<1x8xf32, #tpu.memory_space<vmem>>, %arg5: memref<8x8xf32, #tpu.memory_space<vmem>>, %arg6: memref<16x8xf32, #tpu.memory_space<vmem>>, %arg7: memref<16x1xf32, #tpu.memory_space<vmem>>, %arg8: memref<9x1x256xf32, #tpu.memory_space<vmem>>, %arg9: memref<2x16x256xf32, #tpu.memory_space<vmem>>) attributes {dimension_semantics = [#tpu.dimension_semantics<parallel>], iteration_bounds = array<i64: 2>, scalar_prefetch = 0 : i64, scratch_operands = 0 : i64, tpu.core_type = #tpu.core_type<tc>, window_params = [{transform_indices = @transform_0, window_bounds = array<i64: 2, 8, 256>}, {pipeline_mode = #tpu.pipeline_mode<synchronous>, transform_indices = @transform_1, window_bounds = array<i64: 9, 8, 1>}, {pipeline_mode = #tpu.pipeline_mode<synchronous>, transform_indices = @transform_2, window_bounds = array<i64: 8, 1>}, {pipeline_mode = #tpu.pipeline_mode<synchronous>, transform_indices = @transform_3, window_bounds = array<i64: 1, 8>}, {pipeline_mode = #tpu.pipeline_mode<synchronous>, transform_indices = @transform_4, window_bounds = array<i64: 8, 8>}, {pipeline_mode = #tpu.pipeline_mode<synchronous>, transform_indices = @transform_5, window_bounds = array<i64: 16, 8>}, {pipeline_mode = #tpu.pipeline_mode<synchronous>, transform_indices = @transform_6, window_bounds = array<i64: 16, 1>}, {pipeline_mode = #tpu.pipeline_mode<synchronous>, transform_indices = @transform_7, window_bounds = array<i64: 9, 1, 256>}, {transform_indices = @transform_8, window_bounds = array<i64: 2, 16, 256>}]} {
    %c0 = arith.constant 0 : index
    %c0_0 = arith.constant 0 : index
    %0 = vector.load %arg4[%c0, %c0_0] : memref<1x8xf32, #tpu.memory_space<vmem>>, vector<1x8xf32>
    %c0_1 = arith.constant 0 : index
    %c0_2 = arith.constant 0 : index
    %1 = vector.load %arg5[%c0_1, %c0_2] : memref<8x8xf32, #tpu.memory_space<vmem>>, vector<8x8xf32>
    %c0_3 = arith.constant 0 : index
    %c0_4 = arith.constant 0 : index
    %2 = vector.load %arg6[%c0_3, %c0_4] : memref<16x8xf32, #tpu.memory_space<vmem>>, vector<16x8xf32>
    %c0_5 = arith.constant 0 : index
    %c0_6 = arith.constant 0 : index
    %3 = vector.load %arg7[%c0_5, %c0_6] : memref<16x1xf32, #tpu.memory_space<vmem>>, vector<16x1xf32>
    %c0_7 = arith.constant 0 : index
    %c0_8 = arith.constant 0 : index
    %4 = vector.load %arg3[%c0_7, %c0_8] : memref<8x1xf32, #tpu.memory_space<vmem>>, vector<8x1xf32>
    %c0_9 = arith.constant 0 : index
    %c0_10 = arith.constant 0 : index
    %c0_11 = arith.constant 0 : index
    %5 = vector.load %arg2[%c0_9, %c0_10, %c0_11] : memref<9x8x1xf32, #tpu.memory_space<vmem>>, vector<1x8x1xf32>
    %6 = vector.shape_cast %5 : vector<1x8x1xf32> to vector<8x1xf32>
    %c1 = arith.constant 1 : index
    %c0_12 = arith.constant 0 : index
    %c0_13 = arith.constant 0 : index
    %7 = vector.load %arg2[%c1, %c0_12, %c0_13] : memref<9x8x1xf32, #tpu.memory_space<vmem>>, vector<1x8x1xf32>
    %8 = vector.shape_cast %7 : vector<1x8x1xf32> to vector<8x1xf32>
    %c2 = arith.constant 2 : index
    %c0_14 = arith.constant 0 : index
    %c0_15 = arith.constant 0 : index
    %9 = vector.load %arg2[%c2, %c0_14, %c0_15] : memref<9x8x1xf32, #tpu.memory_space<vmem>>, vector<1x8x1xf32>
    %10 = vector.shape_cast %9 : vector<1x8x1xf32> to vector<8x1xf32>
    %c3 = arith.constant 3 : index
    %c0_16 = arith.constant 0 : index
    %c0_17 = arith.constant 0 : index
    %11 = vector.load %arg2[%c3, %c0_16, %c0_17] : memref<9x8x1xf32, #tpu.memory_space<vmem>>, vector<1x8x1xf32>
    %12 = vector.shape_cast %11 : vector<1x8x1xf32> to vector<8x1xf32>
    %c4 = arith.constant 4 : index
    %c0_18 = arith.constant 0 : index
    %c0_19 = arith.constant 0 : index
    %13 = vector.load %arg2[%c4, %c0_18, %c0_19] : memref<9x8x1xf32, #tpu.memory_space<vmem>>, vector<1x8x1xf32>
    %14 = vector.shape_cast %13 : vector<1x8x1xf32> to vector<8x1xf32>
    %c5 = arith.constant 5 : index
    %c0_20 = arith.constant 0 : index
    %c0_21 = arith.constant 0 : index
    %15 = vector.load %arg2[%c5, %c0_20, %c0_21] : memref<9x8x1xf32, #tpu.memory_space<vmem>>, vector<1x8x1xf32>
    %16 = vector.shape_cast %15 : vector<1x8x1xf32> to vector<8x1xf32>
    %c6 = arith.constant 6 : index
    %c0_22 = arith.constant 0 : index
    %c0_23 = arith.constant 0 : index
    %17 = vector.load %arg2[%c6, %c0_22, %c0_23] : memref<9x8x1xf32, #tpu.memory_space<vmem>>, vector<1x8x1xf32>
    %18 = vector.shape_cast %17 : vector<1x8x1xf32> to vector<8x1xf32>
    %c7 = arith.constant 7 : index
    %c0_24 = arith.constant 0 : index
    %c0_25 = arith.constant 0 : index
    %19 = vector.load %arg2[%c7, %c0_24, %c0_25] : memref<9x8x1xf32, #tpu.memory_space<vmem>>, vector<1x8x1xf32>
    %20 = vector.shape_cast %19 : vector<1x8x1xf32> to vector<8x1xf32>
    %c8 = arith.constant 8 : index
    %c0_26 = arith.constant 0 : index
    %c0_27 = arith.constant 0 : index
    %21 = vector.load %arg2[%c8, %c0_26, %c0_27] : memref<9x8x1xf32, #tpu.memory_space<vmem>>, vector<1x8x1xf32>
    %22 = vector.shape_cast %21 : vector<1x8x1xf32> to vector<8x1xf32>
    %c0_28 = arith.constant 0 : index
    %c0_29 = arith.constant 0 : index
    %c0_30 = arith.constant 0 : index
    %23 = vector.load %arg1[%c0_28, %c0_29, %c0_30] : memref<2x8x256xf32, #tpu.memory_space<vmem>>, vector<1x8x256xf32>
    %24 = vector.shape_cast %23 : vector<1x8x256xf32> to vector<8x256xf32>
    %25 = vector.broadcast %14 : vector<8x1xf32> to vector<8x256xf32>
    %26 = arith.mulf %24, %25 : vector<8x256xf32>
    %c17_i32 = arith.constant 17 : i32
    %27 = tpu.dynamic_rotate %24 by %c17_i32 dim 1 : vector<8x256xf32>, i32 -> vector<8x256xf32>
    %c0_31 = arith.constant 0 : index
    %c0_32 = arith.constant 0 : index
    %c0_33 = arith.constant 0 : index
    %28 = vector.load %arg8[%c0_31, %c0_32, %c0_33] : memref<9x1x256xf32, #tpu.memory_space<vmem>>, vector<1x1x256xf32>
    %29 = vector.shape_cast %28 : vector<1x1x256xf32> to vector<1x256xf32>
    %30 = vector.broadcast %29 : vector<1x256xf32> to vector<8x256xf32>
    %31 = arith.mulf %27, %30 : vector<8x256xf32>
    %32 = vector.broadcast %6 : vector<8x1xf32> to vector<8x256xf32>
    %33 = arith.mulf %31, %32 : vector<8x256xf32>
    %34 = arith.addf %26, %33 : vector<8x256xf32>
    %c16_i32 = arith.constant 16 : i32
    %35 = tpu.dynamic_rotate %24 by %c16_i32 dim 1 : vector<8x256xf32>, i32 -> vector<8x256xf32>
    %c1_34 = arith.constant 1 : index
    %c0_35 = arith.constant 0 : index
    %c0_36 = arith.constant 0 : index
    %36 = vector.load %arg8[%c1_34, %c0_35, %c0_36] : memref<9x1x256xf32, #tpu.memory_space<vmem>>, vector<1x1x256xf32>
    %37 = vector.shape_cast %36 : vector<1x1x256xf32> to vector<1x256xf32>
    %38 = vector.broadcast %37 : vector<1x256xf32> to vector<8x256xf32>
    %39 = arith.mulf %35, %38 : vector<8x256xf32>
    %40 = vector.broadcast %8 : vector<8x1xf32> to vector<8x256xf32>
    %41 = arith.mulf %39, %40 : vector<8x256xf32>
    %42 = arith.addf %34, %41 : vector<8x256xf32>
    %c15_i32 = arith.constant 15 : i32
    %43 = tpu.dynamic_rotate %24 by %c15_i32 dim 1 : vector<8x256xf32>, i32 -> vector<8x256xf32>
    %c2_37 = arith.constant 2 : index
    %c0_38 = arith.constant 0 : index
    %c0_39 = arith.constant 0 : index
    %44 = vector.load %arg8[%c2_37, %c0_38, %c0_39] : memref<9x1x256xf32, #tpu.memory_space<vmem>>, vector<1x1x256xf32>
    %45 = vector.shape_cast %44 : vector<1x1x256xf32> to vector<1x256xf32>
    %46 = vector.broadcast %45 : vector<1x256xf32> to vector<8x256xf32>
    %47 = arith.mulf %43, %46 : vector<8x256xf32>
    %48 = vector.broadcast %10 : vector<8x1xf32> to vector<8x256xf32>
    %49 = arith.mulf %47, %48 : vector<8x256xf32>
    %50 = arith.addf %42, %49 : vector<8x256xf32>
    %c1_i32 = arith.constant 1 : i32
    %51 = tpu.dynamic_rotate %24 by %c1_i32 dim 1 : vector<8x256xf32>, i32 -> vector<8x256xf32>
    %c3_40 = arith.constant 3 : index
    %c0_41 = arith.constant 0 : index
    %c0_42 = arith.constant 0 : index
    %52 = vector.load %arg8[%c3_40, %c0_41, %c0_42] : memref<9x1x256xf32, #tpu.memory_space<vmem>>, vector<1x1x256xf32>
    %53 = vector.shape_cast %52 : vector<1x1x256xf32> to vector<1x256xf32>
    %54 = vector.broadcast %53 : vector<1x256xf32> to vector<8x256xf32>
    %55 = arith.mulf %51, %54 : vector<8x256xf32>
    %56 = vector.broadcast %12 : vector<8x1xf32> to vector<8x256xf32>
    %57 = arith.mulf %55, %56 : vector<8x256xf32>
    %58 = arith.addf %50, %57 : vector<8x256xf32>
    %c255_i32 = arith.constant 255 : i32
    %59 = tpu.dynamic_rotate %24 by %c255_i32 dim 1 : vector<8x256xf32>, i32 -> vector<8x256xf32>
    %c5_43 = arith.constant 5 : index
    %c0_44 = arith.constant 0 : index
    %c0_45 = arith.constant 0 : index
    %60 = vector.load %arg8[%c5_43, %c0_44, %c0_45] : memref<9x1x256xf32, #tpu.memory_space<vmem>>, vector<1x1x256xf32>
    %61 = vector.shape_cast %60 : vector<1x1x256xf32> to vector<1x256xf32>
    %62 = vector.broadcast %61 : vector<1x256xf32> to vector<8x256xf32>
    %63 = arith.mulf %59, %62 : vector<8x256xf32>
    %64 = vector.broadcast %16 : vector<8x1xf32> to vector<8x256xf32>
    %65 = arith.mulf %63, %64 : vector<8x256xf32>
    %66 = arith.addf %58, %65 : vector<8x256xf32>
    %c241_i32 = arith.constant 241 : i32
    %67 = tpu.dynamic_rotate %24 by %c241_i32 dim 1 : vector<8x256xf32>, i32 -> vector<8x256xf32>
    %c6_46 = arith.constant 6 : index
    %c0_47 = arith.constant 0 : index
    %c0_48 = arith.constant 0 : index
    %68 = vector.load %arg8[%c6_46, %c0_47, %c0_48] : memref<9x1x256xf32, #tpu.memory_space<vmem>>, vector<1x1x256xf32>
    %69 = vector.shape_cast %68 : vector<1x1x256xf32> to vector<1x256xf32>
    %70 = vector.broadcast %69 : vector<1x256xf32> to vector<8x256xf32>
    %71 = arith.mulf %67, %70 : vector<8x256xf32>
    %72 = vector.broadcast %18 : vector<8x1xf32> to vector<8x256xf32>
    %73 = arith.mulf %71, %72 : vector<8x256xf32>
    %74 = arith.addf %66, %73 : vector<8x256xf32>
    %c240_i32 = arith.constant 240 : i32
    %75 = tpu.dynamic_rotate %24 by %c240_i32 dim 1 : vector<8x256xf32>, i32 -> vector<8x256xf32>
    %c7_49 = arith.constant 7 : index
    %c0_50 = arith.constant 0 : index
    %c0_51 = arith.constant 0 : index
    %76 = vector.load %arg8[%c7_49, %c0_50, %c0_51] : memref<9x1x256xf32, #tpu.memory_space<vmem>>, vector<1x1x256xf32>
    %77 = vector.shape_cast %76 : vector<1x1x256xf32> to vector<1x256xf32>
    %78 = vector.broadcast %77 : vector<1x256xf32> to vector<8x256xf32>
    %79 = arith.mulf %75, %78 : vector<8x256xf32>
    %80 = vector.broadcast %20 : vector<8x1xf32> to vector<8x256xf32>
    %81 = arith.mulf %79, %80 : vector<8x256xf32>
    %82 = arith.addf %74, %81 : vector<8x256xf32>
    %c239_i32 = arith.constant 239 : i32
    %83 = tpu.dynamic_rotate %24 by %c239_i32 dim 1 : vector<8x256xf32>, i32 -> vector<8x256xf32>
    %c8_52 = arith.constant 8 : index
    %c0_53 = arith.constant 0 : index
    %c0_54 = arith.constant 0 : index
    %84 = vector.load %arg8[%c8_52, %c0_53, %c0_54] : memref<9x1x256xf32, #tpu.memory_space<vmem>>, vector<1x1x256xf32>
    %85 = vector.shape_cast %84 : vector<1x1x256xf32> to vector<1x256xf32>
    %86 = vector.broadcast %85 : vector<1x256xf32> to vector<8x256xf32>
    %87 = arith.mulf %83, %86 : vector<8x256xf32>
    %88 = vector.broadcast %22 : vector<8x1xf32> to vector<8x256xf32>
    %89 = arith.mulf %87, %88 : vector<8x256xf32>
    %90 = arith.addf %82, %89 : vector<8x256xf32>
    %91 = vector.broadcast %4 : vector<8x1xf32> to vector<8x256xf32>
    %92 = arith.addf %90, %91 : vector<8x256xf32>
    %cst = arith.constant dense<0.000000e+00> : vector<8xf32>
    %93 = vector.multi_reduction <add>, %92, %cst [1] : vector<8x256xf32> to vector<8xf32>
    %94 = vector.shape_cast %93 : vector<8xf32> to vector<8x1xf32>
    %95 = arith.mulf %92, %92 : vector<8x256xf32>
    %cst_55 = arith.constant dense<0.000000e+00> : vector<8xf32>
    %96 = vector.multi_reduction <add>, %95, %cst_55 [1] : vector<8x256xf32> to vector<8xf32>
    %97 = vector.shape_cast %96 : vector<8xf32> to vector<8x1xf32>
    %98 = vector.broadcast %94 : vector<8x1xf32> to vector<8x8xf32>
    %99 = arith.mulf %1, %98 : vector<8x8xf32>
    %cst_56 = arith.constant dense<0.000000e+00> : vector<8xf32>
    %100 = vector.multi_reduction <add>, %99, %cst_56 [0] : vector<8x8xf32> to vector<8xf32>
    %101 = vector.shape_cast %100 : vector<8xf32> to vector<1x8xf32>
    %102 = vector.broadcast %97 : vector<8x1xf32> to vector<8x8xf32>
    %103 = arith.mulf %1, %102 : vector<8x8xf32>
    %cst_57 = arith.constant dense<0.000000e+00> : vector<8xf32>
    %104 = vector.multi_reduction <add>, %103, %cst_57 [0] : vector<8x8xf32> to vector<8xf32>
    %105 = vector.shape_cast %104 : vector<8xf32> to vector<1x8xf32>
    %106 = arith.mulf %101, %101 : vector<1x8xf32>
    %107 = arith.subf %105, %106 : vector<1x8xf32>
    %cst_58 = arith.constant 9.99999974E-6 : f32
    %108 = vector.broadcast %cst_58 : f32 to vector<1x8xf32>
    %109 = arith.addf %107, %108 : vector<1x8xf32>
    %110 = math.rsqrt %109 : vector<1x8xf32>
    %111 = arith.mulf %110, %0 : vector<1x8xf32>
    %112 = vector.broadcast %111 : vector<1x8xf32> to vector<16x8xf32>
    %113 = arith.mulf %2, %112 : vector<16x8xf32>
    %114 = vector.broadcast %101 : vector<1x8xf32> to vector<16x8xf32>
    %115 = arith.mulf %113, %114 : vector<16x8xf32>
    %cst_59 = arith.constant dense<0.000000e+00> : vector<16xf32>
    %116 = vector.multi_reduction <add>, %115, %cst_59 [1] : vector<16x8xf32> to vector<16xf32>
    %117 = vector.shape_cast %116 : vector<16xf32> to vector<16x1xf32>
    %118 = arith.subf %3, %117 : vector<16x1xf32>
    %119 = vector.extract_strided_slice %113 {offsets = [0, 0], sizes = [16, 1], strides = [1, 1]} : vector<16x8xf32> to vector<16x1xf32>
    %120 = vector.extract_strided_slice %92 {offsets = [0, 0], sizes = [1, 256], strides = [1, 1]} : vector<8x256xf32> to vector<1x256xf32>
    %121 = vector.broadcast %119 : vector<16x1xf32> to vector<16x256xf32>
    %122 = vector.broadcast %120 : vector<1x256xf32> to vector<16x256xf32>
    %123 = arith.mulf %121, %122 : vector<16x256xf32>
    %124 = vector.broadcast %118 : vector<16x1xf32> to vector<16x256xf32>
    %125 = arith.addf %124, %123 : vector<16x256xf32>
    %126 = vector.extract_strided_slice %113 {offsets = [0, 1], sizes = [16, 1], strides = [1, 1]} : vector<16x8xf32> to vector<16x1xf32>
    %127 = vector.extract_strided_slice %92 {offsets = [1, 0], sizes = [1, 256], strides = [1, 1]} : vector<8x256xf32> to vector<1x256xf32>
    %128 = vector.broadcast %126 : vector<16x1xf32> to vector<16x256xf32>
    %129 = vector.broadcast %127 : vector<1x256xf32> to vector<16x256xf32>
    %130 = arith.mulf %128, %129 : vector<16x256xf32>
    %131 = arith.addf %125, %130 : vector<16x256xf32>
    %132 = vector.extract_strided_slice %113 {offsets = [0, 2], sizes = [16, 1], strides = [1, 1]} : vector<16x8xf32> to vector<16x1xf32>
    %133 = vector.extract_strided_slice %92 {offsets = [2, 0], sizes = [1, 256], strides = [1, 1]} : vector<8x256xf32> to vector<1x256xf32>
    %134 = vector.broadcast %132 : vector<16x1xf32> to vector<16x256xf32>
    %135 = vector.broadcast %133 : vector<1x256xf32> to vector<16x256xf32>
    %136 = arith.mulf %134, %135 : vector<16x256xf32>
    %137 = arith.addf %131, %136 : vector<16x256xf32>
    %138 = vector.extract_strided_slice %113 {offsets = [0, 3], sizes = [16, 1], strides = [1, 1]} : vector<16x8xf32> to vector<16x1xf32>
    %139 = vector.extract_strided_slice %92 {offsets = [3, 0], sizes = [1, 256], strides = [1, 1]} : vector<8x256xf32> to vector<1x256xf32>
    %140 = vector.broadcast %138 : vector<16x1xf32> to vector<16x256xf32>
    %141 = vector.broadcast %139 : vector<1x256xf32> to vector<16x256xf32>
    %142 = arith.mulf %140, %141 : vector<16x256xf32>
    %143 = arith.addf %137, %142 : vector<16x256xf32>
    %144 = vector.extract_strided_slice %113 {offsets = [0, 4], sizes = [16, 1], strides = [1, 1]} : vector<16x8xf32> to vector<16x1xf32>
    %145 = vector.extract_strided_slice %92 {offsets = [4, 0], sizes = [1, 256], strides = [1, 1]} : vector<8x256xf32> to vector<1x256xf32>
    %146 = vector.broadcast %144 : vector<16x1xf32> to vector<16x256xf32>
    %147 = vector.broadcast %145 : vector<1x256xf32> to vector<16x256xf32>
    %148 = arith.mulf %146, %147 : vector<16x256xf32>
    %149 = arith.addf %143, %148 : vector<16x256xf32>
    %150 = vector.extract_strided_slice %113 {offsets = [0, 5], sizes = [16, 1], strides = [1, 1]} : vector<16x8xf32> to vector<16x1xf32>
    %151 = vector.extract_strided_slice %92 {offsets = [5, 0], sizes = [1, 256], strides = [1, 1]} : vector<8x256xf32> to vector<1x256xf32>
    %152 = vector.broadcast %150 : vector<16x1xf32> to vector<16x256xf32>
    %153 = vector.broadcast %151 : vector<1x256xf32> to vector<16x256xf32>
    %154 = arith.mulf %152, %153 : vector<16x256xf32>
    %155 = arith.addf %149, %154 : vector<16x256xf32>
    %156 = vector.extract_strided_slice %113 {offsets = [0, 6], sizes = [16, 1], strides = [1, 1]} : vector<16x8xf32> to vector<16x1xf32>
    %157 = vector.extract_strided_slice %92 {offsets = [6, 0], sizes = [1, 256], strides = [1, 1]} : vector<8x256xf32> to vector<1x256xf32>
    %158 = vector.broadcast %156 : vector<16x1xf32> to vector<16x256xf32>
    %159 = vector.broadcast %157 : vector<1x256xf32> to vector<16x256xf32>
    %160 = arith.mulf %158, %159 : vector<16x256xf32>
    %161 = arith.addf %155, %160 : vector<16x256xf32>
    %162 = vector.extract_strided_slice %113 {offsets = [0, 7], sizes = [16, 1], strides = [1, 1]} : vector<16x8xf32> to vector<16x1xf32>
    %163 = vector.extract_strided_slice %92 {offsets = [7, 0], sizes = [1, 256], strides = [1, 1]} : vector<8x256xf32> to vector<1x256xf32>
    %164 = vector.broadcast %162 : vector<16x1xf32> to vector<16x256xf32>
    %165 = vector.broadcast %163 : vector<1x256xf32> to vector<16x256xf32>
    %166 = arith.mulf %164, %165 : vector<16x256xf32>
    %167 = arith.addf %161, %166 : vector<16x256xf32>
    %c0_60 = arith.constant 0 : index
    %c0_61 = arith.constant 0 : index
    %c0_62 = arith.constant 0 : index
    %168 = vector.load %arg9[%c0_60, %c0_61, %c0_62] : memref<2x16x256xf32, #tpu.memory_space<vmem>>, vector<1x16x256xf32>
    %169 = vector.shape_cast %168 : vector<1x16x256xf32> to vector<16x256xf32>
    %170 = vector.shape_cast %167 : vector<16x256xf32> to vector<1x16x256xf32>
    tpu.vector_store %arg9[%c0_60, %c0_61, %c0_62], %170 {strides = array<i32>} : memref<2x16x256xf32, #tpu.memory_space<vmem>>, vector<1x16x256xf32>,
    %c1_63 = arith.constant 1 : index
    %c0_64 = arith.constant 0 : index
    %c0_65 = arith.constant 0 : index
    %171 = vector.load %arg1[%c1_63, %c0_64, %c0_65] : memref<2x8x256xf32, #tpu.memory_space<vmem>>, vector<1x8x256xf32>
    %172 = vector.shape_cast %171 : vector<1x8x256xf32> to vector<8x256xf32>
    %173 = vector.broadcast %14 : vector<8x1xf32> to vector<8x256xf32>
    %174 = arith.mulf %172, %173 : vector<8x256xf32>
    %c17_i32_66 = arith.constant 17 : i32
    %175 = tpu.dynamic_rotate %172 by %c17_i32_66 dim 1 : vector<8x256xf32>, i32 -> vector<8x256xf32>
    %c0_67 = arith.constant 0 : index
    %c0_68 = arith.constant 0 : index
    %c0_69 = arith.constant 0 : index
    %176 = vector.load %arg8[%c0_67, %c0_68, %c0_69] : memref<9x1x256xf32, #tpu.memory_space<vmem>>, vector<1x1x256xf32>
    %177 = vector.shape_cast %176 : vector<1x1x256xf32> to vector<1x256xf32>
    %178 = vector.broadcast %177 : vector<1x256xf32> to vector<8x256xf32>
    %179 = arith.mulf %175, %178 : vector<8x256xf32>
    %180 = vector.broadcast %6 : vector<8x1xf32> to vector<8x256xf32>
    %181 = arith.mulf %179, %180 : vector<8x256xf32>
    %182 = arith.addf %174, %181 : vector<8x256xf32>
    %c16_i32_70 = arith.constant 16 : i32
    %183 = tpu.dynamic_rotate %172 by %c16_i32_70 dim 1 : vector<8x256xf32>, i32 -> vector<8x256xf32>
    %c1_71 = arith.constant 1 : index
    %c0_72 = arith.constant 0 : index
    %c0_73 = arith.constant 0 : index
    %184 = vector.load %arg8[%c1_71, %c0_72, %c0_73] : memref<9x1x256xf32, #tpu.memory_space<vmem>>, vector<1x1x256xf32>
    %185 = vector.shape_cast %184 : vector<1x1x256xf32> to vector<1x256xf32>
    %186 = vector.broadcast %185 : vector<1x256xf32> to vector<8x256xf32>
    %187 = arith.mulf %183, %186 : vector<8x256xf32>
    %188 = vector.broadcast %8 : vector<8x1xf32> to vector<8x256xf32>
    %189 = arith.mulf %187, %188 : vector<8x256xf32>
    %190 = arith.addf %182, %189 : vector<8x256xf32>
    %c15_i32_74 = arith.constant 15 : i32
    %191 = tpu.dynamic_rotate %172 by %c15_i32_74 dim 1 : vector<8x256xf32>, i32 -> vector<8x256xf32>
    %c2_75 = arith.constant 2 : index
    %c0_76 = arith.constant 0 : index
    %c0_77 = arith.constant 0 : index
    %192 = vector.load %arg8[%c2_75, %c0_76, %c0_77] : memref<9x1x256xf32, #tpu.memory_space<vmem>>, vector<1x1x256xf32>
    %193 = vector.shape_cast %192 : vector<1x1x256xf32> to vector<1x256xf32>
    %194 = vector.broadcast %193 : vector<1x256xf32> to vector<8x256xf32>
    %195 = arith.mulf %191, %194 : vector<8x256xf32>
    %196 = vector.broadcast %10 : vector<8x1xf32> to vector<8x256xf32>
    %197 = arith.mulf %195, %196 : vector<8x256xf32>
    %198 = arith.addf %190, %197 : vector<8x256xf32>
    %c1_i32_78 = arith.constant 1 : i32
    %199 = tpu.dynamic_rotate %172 by %c1_i32_78 dim 1 : vector<8x256xf32>, i32 -> vector<8x256xf32>
    %c3_79 = arith.constant 3 : index
    %c0_80 = arith.constant 0 : index
    %c0_81 = arith.constant 0 : index
    %200 = vector.load %arg8[%c3_79, %c0_80, %c0_81] : memref<9x1x256xf32, #tpu.memory_space<vmem>>, vector<1x1x256xf32>
    %201 = vector.shape_cast %200 : vector<1x1x256xf32> to vector<1x256xf32>
    %202 = vector.broadcast %201 : vector<1x256xf32> to vector<8x256xf32>
    %203 = arith.mulf %199, %202 : vector<8x256xf32>
    %204 = vector.broadcast %12 : vector<8x1xf32> to vector<8x256xf32>
    %205 = arith.mulf %203, %204 : vector<8x256xf32>
    %206 = arith.addf %198, %205 : vector<8x256xf32>
    %c255_i32_82 = arith.constant 255 : i32
    %207 = tpu.dynamic_rotate %172 by %c255_i32_82 dim 1 : vector<8x256xf32>, i32 -> vector<8x256xf32>
    %c5_83 = arith.constant 5 : index
    %c0_84 = arith.constant 0 : index
    %c0_85 = arith.constant 0 : index
    %208 = vector.load %arg8[%c5_83, %c0_84, %c0_85] : memref<9x1x256xf32, #tpu.memory_space<vmem>>, vector<1x1x256xf32>
    %209 = vector.shape_cast %208 : vector<1x1x256xf32> to vector<1x256xf32>
    %210 = vector.broadcast %209 : vector<1x256xf32> to vector<8x256xf32>
    %211 = arith.mulf %207, %210 : vector<8x256xf32>
    %212 = vector.broadcast %16 : vector<8x1xf32> to vector<8x256xf32>
    %213 = arith.mulf %211, %212 : vector<8x256xf32>
    %214 = arith.addf %206, %213 : vector<8x256xf32>
    %c241_i32_86 = arith.constant 241 : i32
    %215 = tpu.dynamic_rotate %172 by %c241_i32_86 dim 1 : vector<8x256xf32>, i32 -> vector<8x256xf32>
    %c6_87 = arith.constant 6 : index
    %c0_88 = arith.constant 0 : index
    %c0_89 = arith.constant 0 : index
    %216 = vector.load %arg8[%c6_87, %c0_88, %c0_89] : memref<9x1x256xf32, #tpu.memory_space<vmem>>, vector<1x1x256xf32>
    %217 = vector.shape_cast %216 : vector<1x1x256xf32> to vector<1x256xf32>
    %218 = vector.broadcast %217 : vector<1x256xf32> to vector<8x256xf32>
    %219 = arith.mulf %215, %218 : vector<8x256xf32>
    %220 = vector.broadcast %18 : vector<8x1xf32> to vector<8x256xf32>
    %221 = arith.mulf %219, %220 : vector<8x256xf32>
    %222 = arith.addf %214, %221 : vector<8x256xf32>
    %c240_i32_90 = arith.constant 240 : i32
    %223 = tpu.dynamic_rotate %172 by %c240_i32_90 dim 1 : vector<8x256xf32>, i32 -> vector<8x256xf32>
    %c7_91 = arith.constant 7 : index
    %c0_92 = arith.constant 0 : index
    %c0_93 = arith.constant 0 : index
    %224 = vector.load %arg8[%c7_91, %c0_92, %c0_93] : memref<9x1x256xf32, #tpu.memory_space<vmem>>, vector<1x1x256xf32>
    %225 = vector.shape_cast %224 : vector<1x1x256xf32> to vector<1x256xf32>
    %226 = vector.broadcast %225 : vector<1x256xf32> to vector<8x256xf32>
    %227 = arith.mulf %223, %226 : vector<8x256xf32>
    %228 = vector.broadcast %20 : vector<8x1xf32> to vector<8x256xf32>
    %229 = arith.mulf %227, %228 : vector<8x256xf32>
    %230 = arith.addf %222, %229 : vector<8x256xf32>
    %c239_i32_94 = arith.constant 239 : i32
    %231 = tpu.dynamic_rotate %172 by %c239_i32_94 dim 1 : vector<8x256xf32>, i32 -> vector<8x256xf32>
    %c8_95 = arith.constant 8 : index
    %c0_96 = arith.constant 0 : index
    %c0_97 = arith.constant 0 : index
    %232 = vector.load %arg8[%c8_95, %c0_96, %c0_97] : memref<9x1x256xf32, #tpu.memory_space<vmem>>, vector<1x1x256xf32>
    %233 = vector.shape_cast %232 : vector<1x1x256xf32> to vector<1x256xf32>
    %234 = vector.broadcast %233 : vector<1x256xf32> to vector<8x256xf32>
    %235 = arith.mulf %231, %234 : vector<8x256xf32>
    %236 = vector.broadcast %22 : vector<8x1xf32> to vector<8x256xf32>
    %237 = arith.mulf %235, %236 : vector<8x256xf32>
    %238 = arith.addf %230, %237 : vector<8x256xf32>
    %239 = vector.broadcast %4 : vector<8x1xf32> to vector<8x256xf32>
    %240 = arith.addf %238, %239 : vector<8x256xf32>
    %cst_98 = arith.constant dense<0.000000e+00> : vector<8xf32>
    %241 = vector.multi_reduction <add>, %240, %cst_98 [1] : vector<8x256xf32> to vector<8xf32>
    %242 = vector.shape_cast %241 : vector<8xf32> to vector<8x1xf32>
    %243 = arith.mulf %240, %240 : vector<8x256xf32>
    %cst_99 = arith.constant dense<0.000000e+00> : vector<8xf32>
    %244 = vector.multi_reduction <add>, %243, %cst_99 [1] : vector<8x256xf32> to vector<8xf32>
    %245 = vector.shape_cast %244 : vector<8xf32> to vector<8x1xf32>
    %246 = vector.broadcast %242 : vector<8x1xf32> to vector<8x8xf32>
    %247 = arith.mulf %1, %246 : vector<8x8xf32>
    %cst_100 = arith.constant dense<0.000000e+00> : vector<8xf32>
    %248 = vector.multi_reduction <add>, %247, %cst_100 [0] : vector<8x8xf32> to vector<8xf32>
    %249 = vector.shape_cast %248 : vector<8xf32> to vector<1x8xf32>
    %250 = vector.broadcast %245 : vector<8x1xf32> to vector<8x8xf32>
    %251 = arith.mulf %1, %250 : vector<8x8xf32>
    %cst_101 = arith.constant dense<0.000000e+00> : vector<8xf32>
    %252 = vector.multi_reduction <add>, %251, %cst_101 [0] : vector<8x8xf32> to vector<8xf32>
    %253 = vector.shape_cast %252 : vector<8xf32> to vector<1x8xf32>
    %254 = arith.mulf %249, %249 : vector<1x8xf32>
    %255 = arith.subf %253, %254 : vector<1x8xf32>
    %cst_102 = arith.constant 9.99999974E-6 : f32
    %256 = vector.broadcast %cst_102 : f32 to vector<1x8xf32>
    %257 = arith.addf %255, %256 : vector<1x8xf32>
    %258 = math.rsqrt %257 : vector<1x8xf32>
    %259 = arith.mulf %258, %0 : vector<1x8xf32>
    %260 = vector.broadcast %259 : vector<1x8xf32> to vector<16x8xf32>
    %261 = arith.mulf %2, %260 : vector<16x8xf32>
    %262 = vector.broadcast %249 : vector<1x8xf32> to vector<16x8xf32>
    %263 = arith.mulf %261, %262 : vector<16x8xf32>
    %cst_103 = arith.constant dense<0.000000e+00> : vector<16xf32>
    %264 = vector.multi_reduction <add>, %263, %cst_103 [1] : vector<16x8xf32> to vector<16xf32>
    %265 = vector.shape_cast %264 : vector<16xf32> to vector<16x1xf32>
    %266 = arith.subf %3, %265 : vector<16x1xf32>
    %267 = vector.extract_strided_slice %261 {offsets = [0, 0], sizes = [16, 1], strides = [1, 1]} : vector<16x8xf32> to vector<16x1xf32>
    %268 = vector.extract_strided_slice %240 {offsets = [0, 0], sizes = [1, 256], strides = [1, 1]} : vector<8x256xf32> to vector<1x256xf32>
    %269 = vector.broadcast %267 : vector<16x1xf32> to vector<16x256xf32>
    %270 = vector.broadcast %268 : vector<1x256xf32> to vector<16x256xf32>
    %271 = arith.mulf %269, %270 : vector<16x256xf32>
    %272 = vector.broadcast %266 : vector<16x1xf32> to vector<16x256xf32>
    %273 = arith.addf %272, %271 : vector<16x256xf32>
    %274 = vector.extract_strided_slice %261 {offsets = [0, 1], sizes = [16, 1], strides = [1, 1]} : vector<16x8xf32> to vector<16x1xf32>
    %275 = vector.extract_strided_slice %240 {offsets = [1, 0], sizes = [1, 256], strides = [1, 1]} : vector<8x256xf32> to vector<1x256xf32>
    %276 = vector.broadcast %274 : vector<16x1xf32> to vector<16x256xf32>
    %277 = vector.broadcast %275 : vector<1x256xf32> to vector<16x256xf32>
    %278 = arith.mulf %276, %277 : vector<16x256xf32>
    %279 = arith.addf %273, %278 : vector<16x256xf32>
    %280 = vector.extract_strided_slice %261 {offsets = [0, 2], sizes = [16, 1], strides = [1, 1]} : vector<16x8xf32> to vector<16x1xf32>
    %281 = vector.extract_strided_slice %240 {offsets = [2, 0], sizes = [1, 256], strides = [1, 1]} : vector<8x256xf32> to vector<1x256xf32>
    %282 = vector.broadcast %280 : vector<16x1xf32> to vector<16x256xf32>
    %283 = vector.broadcast %281 : vector<1x256xf32> to vector<16x256xf32>
    %284 = arith.mulf %282, %283 : vector<16x256xf32>
    %285 = arith.addf %279, %284 : vector<16x256xf32>
    %286 = vector.extract_strided_slice %261 {offsets = [0, 3], sizes = [16, 1], strides = [1, 1]} : vector<16x8xf32> to vector<16x1xf32>
    %287 = vector.extract_strided_slice %240 {offsets = [3, 0], sizes = [1, 256], strides = [1, 1]} : vector<8x256xf32> to vector<1x256xf32>
    %288 = vector.broadcast %286 : vector<16x1xf32> to vector<16x256xf32>
    %289 = vector.broadcast %287 : vector<1x256xf32> to vector<16x256xf32>
    %290 = arith.mulf %288, %289 : vector<16x256xf32>
    %291 = arith.addf %285, %290 : vector<16x256xf32>
    %292 = vector.extract_strided_slice %261 {offsets = [0, 4], sizes = [16, 1], strides = [1, 1]} : vector<16x8xf32> to vector<16x1xf32>
    %293 = vector.extract_strided_slice %240 {offsets = [4, 0], sizes = [1, 256], strides = [1, 1]} : vector<8x256xf32> to vector<1x256xf32>
    %294 = vector.broadcast %292 : vector<16x1xf32> to vector<16x256xf32>
    %295 = vector.broadcast %293 : vector<1x256xf32> to vector<16x256xf32>
    %296 = arith.mulf %294, %295 : vector<16x256xf32>
    %297 = arith.addf %291, %296 : vector<16x256xf32>
    %298 = vector.extract_strided_slice %261 {offsets = [0, 5], sizes = [16, 1], strides = [1, 1]} : vector<16x8xf32> to vector<16x1xf32>
    %299 = vector.extract_strided_slice %240 {offsets = [5, 0], sizes = [1, 256], strides = [1, 1]} : vector<8x256xf32> to vector<1x256xf32>
    %300 = vector.broadcast %298 : vector<16x1xf32> to vector<16x256xf32>
    %301 = vector.broadcast %299 : vector<1x256xf32> to vector<16x256xf32>
    %302 = arith.mulf %300, %301 : vector<16x256xf32>
    %303 = arith.addf %297, %302 : vector<16x256xf32>
    %304 = vector.extract_strided_slice %261 {offsets = [0, 6], sizes = [16, 1], strides = [1, 1]} : vector<16x8xf32> to vector<16x1xf32>
    %305 = vector.extract_strided_slice %240 {offsets = [6, 0], sizes = [1, 256], strides = [1, 1]} : vector<8x256xf32> to vector<1x256xf32>
    %306 = vector.broadcast %304 : vector<16x1xf32> to vector<16x256xf32>
    %307 = vector.broadcast %305 : vector<1x256xf32> to vector<16x256xf32>
    %308 = arith.mulf %306, %307 : vector<16x256xf32>
    %309 = arith.addf %303, %308 : vector<16x256xf32>
    %310 = vector.extract_strided_slice %261 {offsets = [0, 7], sizes = [16, 1], strides = [1, 1]} : vector<16x8xf32> to vector<16x1xf32>
    %311 = vector.extract_strided_slice %240 {offsets = [7, 0], sizes = [1, 256], strides = [1, 1]} : vector<8x256xf32> to vector<1x256xf32>
    %312 = vector.broadcast %310 : vector<16x1xf32> to vector<16x256xf32>
    %313 = vector.broadcast %311 : vector<1x256xf32> to vector<16x256xf32>
    %314 = arith.mulf %312, %313 : vector<16x256xf32>
    %315 = arith.addf %309, %314 : vector<16x256xf32>
    %c1_104 = arith.constant 1 : index
    %c0_105 = arith.constant 0 : index
    %c0_106 = arith.constant 0 : index
    %316 = vector.load %arg9[%c1_104, %c0_105, %c0_106] : memref<2x16x256xf32, #tpu.memory_space<vmem>>, vector<1x16x256xf32>
    %317 = vector.shape_cast %316 : vector<1x16x256xf32> to vector<16x256xf32>
    %318 = vector.shape_cast %315 : vector<16x256xf32> to vector<1x16x256xf32>
    tpu.vector_store %arg9[%c1_104, %c0_105, %c0_106], %318 {strides = array<i32>} : memref<2x16x256xf32, #tpu.memory_space<vmem>>, vector<1x16x256xf32>,
    return
  }
  func.func @transform_0(%arg0: i32) -> (i32, i32, i32) {
    %c0_i32 = arith.constant 0 : i32
    %c0_i32_0 = arith.constant 0 : i32
    %c0_i32_1 = arith.constant 0 : i32
    return %arg0, %c0_i32, %c0_i32_0 : i32, i32, i32
  }
  func.func @transform_1(%arg0: i32) -> (i32, i32, i32) {
    %c0_i32 = arith.constant 0 : i32
    %c0_i32_0 = arith.constant 0 : i32
    %c0_i32_1 = arith.constant 0 : i32
    %c0_i32_2 = arith.constant 0 : i32
    return %c0_i32, %c0_i32_0, %c0_i32_1 : i32, i32, i32
  }
  func.func @transform_2(%arg0: i32) -> (i32, i32) {
    %c0_i32 = arith.constant 0 : i32
    %c0_i32_0 = arith.constant 0 : i32
    %c0_i32_1 = arith.constant 0 : i32
    return %c0_i32, %c0_i32_0 : i32, i32
  }
  func.func @transform_3(%arg0: i32) -> (i32, i32) {
    %c0_i32 = arith.constant 0 : i32
    %c0_i32_0 = arith.constant 0 : i32
    %c0_i32_1 = arith.constant 0 : i32
    return %c0_i32, %c0_i32_0 : i32, i32
  }
  func.func @transform_4(%arg0: i32) -> (i32, i32) {
    %c0_i32 = arith.constant 0 : i32
    %c0_i32_0 = arith.constant 0 : i32
    %c0_i32_1 = arith.constant 0 : i32
    return %c0_i32, %c0_i32_0 : i32, i32
  }
  func.func @transform_5(%arg0: i32) -> (i32, i32) {
    %c0_i32 = arith.constant 0 : i32
    %c0_i32_0 = arith.constant 0 : i32
    %c0_i32_1 = arith.constant 0 : i32
    return %c0_i32, %c0_i32_0 : i32, i32
  }
  func.func @transform_6(%arg0: i32) -> (i32, i32) {
    %c0_i32 = arith.constant 0 : i32
    %c0_i32_0 = arith.constant 0 : i32
    %c0_i32_1 = arith.constant 0 : i32
    return %c0_i32, %c0_i32_0 : i32, i32
  }
  func.func @transform_7(%arg0: i32) -> (i32, i32, i32) {
    %c0_i32 = arith.constant 0 : i32
    %c0_i32_0 = arith.constant 0 : i32
    %c0_i32_1 = arith.constant 0 : i32
    %c0_i32_2 = arith.constant 0 : i32
    return %c0_i32, %c0_i32_0, %c0_i32_1 : i32, i32, i32
  }
  func.func @transform_8(%arg0: i32) -> (i32, i32, i32) {
    %c0_i32 = arith.constant 0 : i32
    %c0_i32_0 = arith.constant 0 : i32
    %c0_i32_1 = arith.constant 0 : i32
    return %arg0, %c0_i32, %c0_i32_0 : i32, i32, i32
  }
}

</mosaic_0001>

<bundles_post_ra>
// kernel: tpu_custom_call.1
= control target key start
LH: loop header
LB: loop body
LE: loop exit
PB: predicated region body
PF: predicated region fallthrough
CT: control target
= control target key end

     0   :  { %13 = vsyncpa [#allocation3], 0  ;;  %s2410_s0 = inlined_call_operand.vmem [shape: f32[4,8,256], index: 0, kind: input, shape index: {}]   ;;  %s2411_s1 = inlined_call_operand.vmem [shape: f32[9,8,1], index: 1, kind: input, shape index: {}]   ;;  %s2412_s2 = inlined_call_operand.vmem [shape: f32[8,1], index: 2, kind: input, shape index: {}]   ;;  %s2413_s3 = inlined_call_operand.vmem [shape: f32[1,8], index: 3, kind: input, shape index: {}]   ;;  %s2414_s4 = inlined_call_operand.vmem [shape: f32[8,8], index: 4, kind: input, shape index: {}]   ;;  %s2415_s5 = inlined_call_operand.vmem [shape: f32[16,8], index: 5, kind: input, shape index: {}]   ;;  %s2416_s6 = inlined_call_operand.vmem [shape: f32[16,1], index: 6, kind: input, shape index: {}]   ;;  %s2417_s7 = inlined_call_operand.vmem [shape: f32[9,1,256], index: 7, kind: input, shape index: {}]   ;;  %s2418_s8 = inlined_call_operand.hbm [shape: f32[4,16,256], index: 8, kind: output, shape index: {}]  }
   0x1   :  { %15 = vsyncpa [#allocation3 + $0x1], 0  ;;  %s1640_s27 = smov 0   ;;  %s1642_s28 = smov 0  }
   0x2   :  { %s1644_s29 = smov 0   ;;  %s1646_s30 = smov 0  }
   0x3 LB: > { %s1661_s9 = sadd.s32 4294967295, %s1575_s30   ;;  %s1383_s10 = sadd.s32 4294967294, %s1575_s30   ;;  %s1575_s30 = sphi %s1646_s30, %s2461_s30   ;;  %s1571_s29 = sphi %s1644_s29, %s2460_s29   ;;  %s1567_s28 = sphi %s1642_s28, %s2459_s28   ;;  %s1563_s27 = sphi %s1640_s27, %s2458_s27  }
   0x4   : > { %s1665_s11 = sadd.s32 1, %s1575_s30   ;;  %s201_s12 = sadd.s32 1, %s1571_s29 }
   0x5   : > { %s198_s13 = ssub.s32 %s1575_s30, %s1665_s11  ;;  %p211_p0 = scmp.ne.s32.totalorder %s1571_s29, %s1567_s28 }
   0x6   : > { %p199_p1 = scmp.eq.s32.totalorder %s198_s13, 0  ;;  %p212_p2 = scmp.eq.s32.totalorder %s1661_s9, 1 }
   0x7   : > { %p217_p3 = scmp.ne.s32.totalorder %s1567_s28, %s1563_s27  ;;  %p218_p4 = scmp.eq.s32.totalorder %s1383_s10, 1 }
   0x8   : > { %s1676_s14 = scalar_select %p199_p1, %s1571_s29, %s201_s12  }
   0x9   : > { %p1678_p5 = por %p212_p2, %p211_p0  ;;  %p1682_p6 = por %p218_p4, %p217_p3 }
   0xa   : > { %p1386_p7 = scmp.ge.s32.totalorder %s1575_s30, 1  ;;  %p267_p8 = scmp.lt.s32.totalorder %s1575_s30, 3 }
   0xc   : > { %p268_p9 = pnand %p1386_p7, %p267_p8 }
   0xe   : > { %271 = sbr.rel (%p268_p9) target bundleno = 774 (0x306), region = 52 }
  0x15   : > { %v1394_v0 = vld [vmem:[%s2411_s1 + $0x20] sm:$0xff]  ;;  %v1391_v1 = vld [vmem:[%s2411_s1 + $0x8] sm:$0xff]  ;;  %s1388_s21 = sshll.u32 %s1661_s9, 1  ;;  %v1577_v2 = vmov 0   ;;  %v1392_v3 = vld [vmem:[%s2411_s1 + $0x10] sm:$0xff]  ;;  %s1578_s17 = smov 17   ;;  %v347_v15 = vlaneseq }
  0x16   : > { %1485 = vset.pattern.permute.xlu1 %v1577_v2  ;;  %1484 = vset.pattern.permute.xlu0 %v1577_v2  ;;  %p303_p10 = scmp.lt.s32.totalorder %s1388_s21, 3  ;;  %v317_v4 = vld [vmem:[%s2411_s1] sm:$0xff]  ;;  %s1579_s18 = smov 16   ;;  %v1393_v9 = vld [vmem:[%s2411_s1 + $0x18] sm:$0xff]  ;;  %v1395_v10 = vld [vmem:[%s2411_s1 + $0x28] sm:$0xff]  ;;  %vm608_vm8 = vcmask 64512  }
  0x17   : > { %338 = vperm.xlu0 %1484, %v1394_v0   ;;  %399 = vperm.xlu1 %1485, %v1391_v1   ;;  %s1581_s24 = smov 1   ;;  %v1396_v11 = vld [vmem:[%s2411_s1 + $0x30] sm:$0xff]  ;;  %s1582_s10 = smov 127   ;;  %v1397_v12 = vld [vmem:[%s2411_s1 + $0x38] sm:$0xff]  ;;  %v1398_v13 = vld [vmem:[%s2411_s1 + $0x40] sm:$0xff]  ;;  %v1770_v18 = vshrl.u32 %v347_v15, 7 }
  0x18   : > { %s2463_s21 = smov (!%p303_p10, %s1388_s21), 3  ;;  %s1585_s22 = smov 111   ;;  %v316_v14 = vld [vmem:[%s2412_s2] sm:$0xff]  ;;  %v1772_v19 = vand.u32 127, %v347_v15 }
  0x19   : > { %s1425_s26 = sshll.u32 %s2463_s21, 4  ;;  %s1580_s21 = smov 15   ;;  %v1777_v22 = vsub.s32 0, %v1770_v18  ;;  %v1780_v23 = vsub.s32 1, %v1770_v18  ;;  %v352_v24 = vld [vmem:[%s2417_s7] sm:$0x3] }
  0x1a   : > { %s307_s13 = scalar_lea.vmem %s2410_s0, %s1425_s26  ;;  %vm349_vm0 = vcmp.lt.s32.totalorder %v1772_v19, 17  ;;  %v864_v25 = vld [vmem:[%s2417_s7] sm:$0x3]  ;;  %v1399_v34 = vld [vmem:[%s2417_s7 + $0x2] sm:$0x3]  ;;  %vm379_vm1 = vcmp.lt.s32.totalorder %v1772_v19, 16 }
  0x1b   : > { %430 = vperm.xlu1 %1485, %v1392_v3   ;;  %368 = vperm.xlu0 %1484, %v317_v4   ;;  %v1706_v5 = vld [vmem:[%s307_s13 + $0x8] sm:$0xff]  ;;  %v1708_v6 = vld [vmem:[%s307_s13] sm:$0xff]  ;;  %v1712_v7 = vld [vmem:[%s307_s13 + $0x10] sm:$0xff]  ;;  %v357_v27 = vrot.slane %v352_v24, %v1777_v22  ;;  %v361_v28 = vrot.slane %v352_v24, %v1780_v23  ;;  %v869_v32 = vrot.slane %v864_v25, %v1777_v22  ;;  %vm410_vm2 = vcmp.lt.s32.totalorder %v1772_v19, 15 }
  0x1c   : > { %v1714_v8 = vld [vmem:[%s307_s13 + $0x18] sm:$0xff]  ;;  %v873_v33 = vrot.slane %v864_v25, %v1780_v23  ;;  %v388_v43 = vrot.slane %v1399_v34, %v1777_v22  ;;  %v392_v44 = vrot.slane %v1399_v34, %v1780_v23  ;;  %v1408_v61 = vld [vmem:[%s2417_s7 + $0x2] sm:$0x3]  ;;  %v1409_v24 = vld [vmem:[%s2417_s7 + $0x4] sm:$0x3]  ;;  %vm441_vm3 = vcmp.lt.s32.totalorder %v1772_v19, 1 }
  0x1d   : > { %vm472_vm4 = vcmp.lt.s32.totalorder %v1772_v19, 127  ;;  %vm503_vm5 = vcmp.lt.s32.totalorder %v1772_v19, 113  ;;  %vm534_vm6 = vcmp.lt.s32.totalorder %v1772_v19, 112  ;;  %vm565_vm7 = vcmp.lt.s32.totalorder %v1772_v19, 111 }
  0x1f   : > { %345 = vrot.lane.b32.xlu0 %v1706_v5, %s1578_s17  ;;  %343 = vrot.lane.b32.xlu1 %v1708_v6, %s1578_s17 }
  0x23   : > { %858 = vrot.lane.b32.xlu0 %v1712_v7, %s1578_s17  ;;  %860 = vrot.lane.b32.xlu1 %v1714_v8, %s1578_s17  ;;  %s1583_s17 = smov 113  }
  0x27   : > { %375 = vrot.lane.b32.xlu0 %v1708_v6, %s1579_s18  ;;  %377 = vrot.lane.b32.xlu1 %v1706_v5, %s1579_s18 }
  0x2b   : > { %461 = vperm.xlu0 %1484, %v1393_v9   ;;  %882 = vrot.lane.b32.xlu1 %v1712_v7, %s1579_s18  ;;  %v1400_v9 = vld [vmem:[%s2417_s7 + $0x4] sm:$0x3] }
  0x2f   : > { %884 = vrot.lane.b32.xlu0 %v1714_v8, %s1579_s18  ;;  %406 = vrot.lane.b32.xlu1 %v1708_v6, %s1580_s21 }
  0x33   : > { %408 = vrot.lane.b32.xlu0 %v1706_v5, %s1580_s21  ;;  %492 = vperm.xlu1 %1485, %v1395_v10  }
  0x37   : > { %906 = vrot.lane.b32.xlu0 %v1712_v7, %s1580_s21  ;;  %908 = vrot.lane.b32.xlu1 %v1714_v8, %s1580_s21  ;;  %s1584_s21 = smov 112  }
  0x3b   : > { %437 = vrot.lane.b32.xlu0 %v1708_v6, %s1581_s24  ;;  %439 = vrot.lane.b32.xlu1 %v1706_v5, %s1581_s24 }
  0x3f   : > { %523 = vperm.xlu0 %1484, %v1396_v11   ;;  %930 = vrot.lane.b32.xlu1 %v1712_v7, %s1581_s24 }
  0x43   : > { %932 = vrot.lane.b32.xlu0 %v1714_v8, %s1581_s24  ;;  %468 = vrot.lane.b32.xlu1 %v1708_v6, %s1582_s10  ;;  %s1427_s24 = sshll.u32 %s1661_s9, 10 }
  0x44   : > { %s2360_s12 = scalar_lea.hbm %s2418_s8, %s1427_s24 }
  0x47   : > { %470 = vrot.lane.b32.xlu0 %v1706_v5, %s1582_s10  ;;  %554 = vperm.xlu1 %1485, %v1397_v12  }
  0x4b   : > { %954 = vrot.lane.b32.xlu0 %v1712_v7, %s1582_s10  ;;  %956 = vrot.lane.b32.xlu1 %v1714_v8, %s1582_s10 }
  0x4f   : > { %499 = vrot.lane.b32.xlu0 %v1708_v6, %s1583_s17  ;;  %501 = vrot.lane.b32.xlu1 %v1706_v5, %s1583_s17 }
  0x53   : > { %585 = vperm.xlu0 %1484, %v1398_v13   ;;  %978 = vrot.lane.b32.xlu1 %v1712_v7, %s1583_s17 }
  0x57   : > { %530 = vrot.lane.b32.xlu1 %v1708_v6, %s1584_s21  ;;  %980 = vrot.lane.b32.xlu0 %v1714_v8, %s1583_s17  ;;  %s1593_s17 = smov [#allocation2]  }
  0x58   : > { %s1517_s19 = sshll.u32 %s1593_s17, 4  ;;  %s1518_s19 = int_to_ptr.vmem [resolvable:$false] %s1517_s19 }
  0x59   : > { %s1519_s20 = scalar_lea.vmem %s1518_s19, 2048 }
  0x5b   : > { %1002 = vrot.lane.b32.xlu1 %v1712_v7, %s1584_s21  ;;  %532 = vrot.lane.b32.xlu0 %v1706_v5, %s1584_s21 }
  0x5f   : > { %561 = vrot.lane.b32.xlu1 %v1708_v6, %s1585_s22  ;;  %1004 = vrot.lane.b32.xlu0 %v1714_v8, %s1584_s21  ;;  %s299_s21 = sand.u32 1, %s1567_s28  }
  0x60   : > { %s2368_s9 = scalar_lea.sflag [#allocation3], %s299_s21 }
  0x63   : > { %594 = vperm.xlu1 %1485, %v316_v14   ;;  %563 = vrot.lane.b32.xlu0 %v1706_v5, %s1585_s22 }
  0x67   : > { %1026 = vrot.lane.b32.xlu0 %v1712_v7, %s1585_s22  ;;  %1028 = vrot.lane.b32.xlu1 %v1714_v8, %s1585_s22  ;;  %s1387_s22 = sshll.u32 %s299_s21, 6 }
  0x68   : > { %s2337_s23 = scalar_lea.vmem [#allocation2], %s1387_s22 }
  0x69   : > { %s1321_s25 = sshll.u32 %s2337_s23, 4  ;;  %s2362_s25 = int_to_ptr.vmem [resolvable:$true] %s1321_s25 }
  0x6a   : > { %s1513_s13 = scalar_lea.vmem %s2362_s25, 1024  ;;  %p1520_p0 = scmp.lt.s32.totalorder %s2362_s25, %s1518_s19 }
  0x6b   : > { %p1514_p11 = scmp.ne.s32.totalorder %s2362_s25, %s1513_s13  ;;  %p1521_p1 = scmp.lt.s32.totalorder %s1519_s20, %s1513_s13 }
  0x6d   : > { %p1515_p12 = pnand %p1514_p11, %p1678_p5  ;;  %p1522_p2 = por %p1521_p1, %p1520_p0 }
  0x6f   : > { %p1516_p13 = pneg %p1515_p12 }
  0x71   : > { %p1523_p3 = pnand %p1522_p2, %p1516_p13 }
  0x96   : > { %v339_v16 = vpop.permute.xlu0 %338  ;;  %v1768_v17 = vpop.permute.xlu1 %399 }
  0x97   : > { %v856_v45 = vmul.f32 %v1712_v7, %v339_v16  ;;  %v857_v46 = vmul.f32 %v1714_v8, %v339_v16  ;;  %v341_v53 = vmul.f32 %v339_v16, %v1708_v6  ;;  %v342_v54 = vmul.f32 %v339_v16, %v1706_v5 }
  0x98   : > { %v893_v7 = vrot.slane %v1408_v61, %v1777_v22  ;;  %v897_v8 = vrot.slane %v1408_v61, %v1780_v23  ;;  %v419_v16 = vrot.slane %v1400_v9, %v1777_v22 }
  0x9a   : > { %v1774_v20 = vpop.permute.xlu1 %430  ;;  %v369_v21 = vpop.permute.xlu0 %368 }
  0x9e   : > { %v346_v26 = vpop.permute.xlu0 %345  ;;  %v344_v29 = vpop.permute.xlu1 %343 }
  0x9f   : > { %v350_v30 = vsel %vm349_vm0, %v344_v29, %v346_v26  ;;  %v351_v31 = vsel %vm349_vm0, %v346_v26, %v344_v29 }
  0xa0   : > { %v364_v35 = vmul.f32 %v357_v27, %v351_v31  ;;  %v365_v36 = vmul.f32 %v361_v28, %v350_v30  ;;  %v917_v31 = vrot.slane %v1409_v24, %v1777_v22 }
  0xa2   : > { %v859_v37 = vpop.permute.xlu0 %858  ;;  %v861_v38 = vpop.permute.xlu1 %860  ;;  %v371_v47 = vmul.f32 %v369_v21, %v364_v35  ;;  %v372_v48 = vmul.f32 %v369_v21, %v365_v36 }
  0xa3   : > { %v862_v39 = vsel %vm349_vm0, %v859_v37, %v861_v38  ;;  %v863_v40 = vsel %vm349_vm0, %v861_v38, %v859_v37 }
  0xa4   : > { %v876_v41 = vmul.f32 %v869_v32, %v863_v40  ;;  %v877_v42 = vmul.f32 %v873_v33, %v862_v39  ;;  %v373_v62 = vadd.f32 %v371_v47, %v341_v53  ;;  %v374_v63 = vadd.f32 %v372_v48, %v342_v54 }
  0xa5   : > { %v921_v32 = vrot.slane %v1409_v24, %v1780_v23  ;;  %v1404_v24 = vld [vmem:[%s2417_s7 + $0xe] sm:$0x3] }
  0xa6   : > { %v878_v49 = vmul.f32 %v876_v41, %v369_v21  ;;  %v879_v50 = vmul.f32 %v877_v42, %v369_v21  ;;  %v376_v51 = vpop.permute.xlu0 %375  ;;  %v378_v52 = vpop.permute.xlu1 %377  ;;  %v423_v21 = vrot.slane %v1400_v9, %v1780_v23 }
  0xa7   : > { %v380_v55 = vsel %vm379_vm1, %v376_v51, %v378_v52  ;;  %v381_v56 = vsel %vm379_vm1, %v378_v52, %v376_v51 }
  0xa8   : > { %v880_v57 = vadd.f32 %v878_v49, %v856_v45  ;;  %v881_v58 = vadd.f32 %v879_v50, %v857_v46  ;;  %v395_v59 = vmul.f32 %v388_v43, %v381_v56  ;;  %v396_v60 = vmul.f32 %v392_v44, %v380_v55 }
  0xaa   : > { %v402_v0 = vmul.f32 %v1768_v17, %v395_v59  ;;  %v403_v1 = vmul.f32 %v1768_v17, %v396_v60  ;;  %v1820_v3 = vpop.permute.xlu0 %461  ;;  %v883_v4 = vpop.permute.xlu1 %882  ;;  %v1410_v60 = vld [vmem:[%s2417_s7 + $0x6] sm:$0x3] }
  0xac   : > { %v404_v5 = vadd.f32 %v402_v0, %v373_v62  ;;  %v405_v6 = vadd.f32 %v403_v1, %v374_v63  ;;  %v1402_v63 = vld [vmem:[%s2417_s7 + $0xa] sm:$0x3] }
  0xad   : > { %v1881_v1 = vld [vmem:[%s2417_s7 + $0xa] sm:$0x3] }
  0xae   : > { %v885_v10 = vpop.permute.xlu0 %884  ;;  %v407_v11 = vpop.permute.xlu1 %406 }
  0xaf   : > { %v886_v12 = vsel %vm379_vm1, %v883_v4, %v885_v10  ;;  %v887_v13 = vsel %vm379_vm1, %v885_v10, %v883_v4  ;;  %v1403_v4 = vld [vmem:[%s2417_s7 + $0xc] sm:$0x3] }
  0xb0   : > { %v900_v14 = vmul.f32 %v893_v7, %v887_v13  ;;  %v901_v15 = vmul.f32 %v897_v8, %v886_v12  ;;  %v945_v7 = vrot.slane %v1410_v60, %v1780_v23  ;;  %v1893_v8 = vld [vmem:[%s2417_s7 + $0xc] sm:$0x3]  ;;  %v485_v12 = vrot.slane %v1402_v63, %v1780_v23 }
  0xb2   : > { %v902_v25 = vmul.f32 %v900_v14, %v1768_v17  ;;  %v903_v26 = vmul.f32 %v901_v15, %v1768_v17  ;;  %v409_v27 = vpop.permute.xlu0 %408  ;;  %v1839_v28 = vpop.permute.xlu1 %492  ;;  %v965_v15 = vrot.slane %v1881_v1, %v1777_v22 }
  0xb3   : > { %v411_v29 = vsel %vm410_vm2, %v407_v11, %v409_v27  ;;  %v412_v30 = vsel %vm410_vm2, %v409_v27, %v407_v11  ;;  %v481_v11 = vrot.slane %v1402_v63, %v1777_v22 }
  0xb4   : > { %v904_v33 = vadd.f32 %v902_v25, %v880_v57  ;;  %v905_v34 = vadd.f32 %v903_v26, %v881_v58  ;;  %v426_v35 = vmul.f32 %v419_v16, %v412_v30  ;;  %v427_v36 = vmul.f32 %v423_v21, %v411_v29  ;;  %v1915_v25 = vld [vmem:[%s2417_s7 + $0xe] sm:$0x3] }
  0xb5   : > { %v969_v16 = vrot.slane %v1881_v1, %v1780_v23  ;;  %v512_v21 = vrot.slane %v1403_v4, %v1777_v22  ;;  %v516_v29 = vrot.slane %v1403_v4, %v1780_v23  ;;  %v989_v30 = vrot.slane %v1893_v8, %v1777_v22 }
  0xb6   : > { %v433_v37 = vmul.f32 %v1774_v20, %v426_v35  ;;  %v434_v17 = vmul.f32 %v1774_v20, %v427_v36  ;;  %v907_v38 = vpop.permute.xlu0 %906  ;;  %v909_v39 = vpop.permute.xlu1 %908  ;;  %v1935_v35 = vld [vmem:[%s2417_s7 + $0x10] sm:$0x3] }
  0xb7   : > { %v910_v40 = vsel %vm410_vm2, %v907_v38, %v909_v39  ;;  %v911_v41 = vsel %vm410_vm2, %v909_v39, %v907_v38  ;;  %v547_v38 = vrot.slane %v1404_v24, %v1780_v23  ;;  %v1013_v39 = vrot.slane %v1915_v25, %v1777_v22 }
  0xb8   : > { %v1853_v42 = vadd.f32 %v433_v37, %v404_v5  ;;  %v1855_v43 = vadd.f32 %v434_v17, %v405_v6  ;;  %v924_v44 = vmul.f32 %v917_v31, %v911_v41  ;;  %v925_v45 = vmul.f32 %v921_v32, %v910_v40 }
  0xb9   : > { %v941_v6 = vrot.slane %v1410_v60, %v1777_v22  ;;  %v543_v17 = vrot.slane %v1404_v24, %v1777_v22  ;;  %v1017_v40 = vrot.slane %v1915_v25, %v1780_v23 }
  0xba   : > { %v926_v46 = vmul.f32 %v924_v44, %v1774_v20  ;;  %v927_v47 = vmul.f32 %v925_v45, %v1774_v20  ;;  %v438_v48 = vpop.permute.xlu0 %437  ;;  %v440_v49 = vpop.permute.xlu1 %439  ;;  %v1401_v20 = vld [vmem:[%s2417_s7 + $0x6] sm:$0x3] }
  0xbb   : > { %v450_v0 = vrot.slane %v1401_v20, %v1777_v22  ;;  %v454_v5 = vrot.slane %v1401_v20, %v1780_v23  ;;  %v442_v9 = vsel %vm441_vm3, %v438_v48, %v440_v49  ;;  %v443_v10 = vsel %vm441_vm3, %v440_v49, %v438_v48 }
  0xbc   : > { %v1859_v50 = vadd.f32 %v926_v46, %v904_v33  ;;  %v1861_v51 = vadd.f32 %v927_v47, %v905_v34  ;;  %v993_v33 = vrot.slane %v1893_v8, %v1780_v23  ;;  %v1930_v34 = vld [vmem:[%s2417_s7 + $0x10] sm:$0x3]  ;;  %v1037_v49 = vrot.slane %v1935_v35, %v1777_v22 }
  0xbd   : > { %v457_v31 = vmul.f32 %v450_v0, %v443_v10  ;;  %v458_v32 = vmul.f32 %v454_v5, %v442_v9  ;;  %v574_v47 = vrot.slane %v1930_v34, %v1777_v22  ;;  %v578_v48 = vrot.slane %v1930_v34, %v1780_v23 }
  0xbe   : > { %v1863_v52 = vpop.permute.xlu0 %523  ;;  %v931_v53 = vpop.permute.xlu1 %930 }
  0xbf   : > { %v465_v20 = vmul.f32 %v1820_v3, %v458_v32 }
  0xc2   : > { %v933_v54 = vpop.permute.xlu0 %932  ;;  %v469_v55 = vpop.permute.xlu1 %468 }
  0xc3   : > { %v934_v26 = vsel %vm441_vm3, %v931_v53, %v933_v54  ;;  %v935_v27 = vsel %vm441_vm3, %v933_v54, %v931_v53  ;;  %v1041_v53 = vrot.slane %v1935_v35, %v1780_v23  ;;  %v464_v54 = vmul.f32 %v1820_v3, %v457_v31 }
  0xc4   : > { %v948_v41 = vmul.f32 %v941_v6, %v935_v27  ;;  %v949_v44 = vmul.f32 %v945_v7, %v934_v26 }
  0xc6   : > { %v471_v56 = vpop.permute.xlu0 %470  ;;  %v1865_v57 = vpop.permute.xlu1 %554  ;;  %v950_v6 = vmul.f32 %v948_v41, %v1820_v3  ;;  %v951_v7 = vmul.f32 %v949_v44, %v1820_v3 }
  0xc7   : > { %v473_v45 = vsel %vm472_vm4, %v469_v55, %v471_v56  ;;  %v474_v46 = vsel %vm472_vm4, %v471_v56, %v469_v55 }
  0xc8   : > { %v488_v60 = vmul.f32 %v481_v11, %v473_v45  ;;  %v489_v63 = vmul.f32 %v485_v12, %v474_v46  ;;  %v467_v11 = vadd.f32 %v465_v20, %v1855_v43  ;;  %v952_v43 = vadd.f32 %v950_v6, %v1859_v50 }
  0xca   : > { %v955_v58 = vpop.permute.xlu0 %954  ;;  %v957_v59 = vpop.permute.xlu1 %956  ;;  %v495_v24 = vmul.f32 %v1839_v28, %v488_v60  ;;  %v496_v25 = vmul.f32 %v1839_v28, %v489_v63 }
  0xcb   : > { %v958_v0 = vsel %vm472_vm4, %v955_v58, %v957_v59  ;;  %v959_v1 = vsel %vm472_vm4, %v957_v59, %v955_v58  ;;  %v466_v59 = vadd.f32 %v464_v54, %v1853_v42 }
  0xcc   : > { %v972_v12 = vmul.f32 %v965_v15, %v958_v0  ;;  %v973_v3 = vmul.f32 %v969_v16, %v959_v1 }
  0xce   : > { %v500_v61 = vpop.permute.xlu0 %499  ;;  %v502_v62 = vpop.permute.xlu1 %501 }
  0xcf   : > { %v504_v55 = vsel %vm503_vm5, %v500_v61, %v502_v62  ;;  %v505_v56 = vsel %vm503_vm5, %v502_v62, %v500_v61 }
  0xd0   : > { %v519_v62 = vmul.f32 %v512_v21, %v504_v55  ;;  %v520_v9 = vmul.f32 %v516_v29, %v505_v56 }
  0xd2   : > { %v1901_v13 = vpop.permute.xlu0 %585  ;;  %v979_v14 = vpop.permute.xlu1 %978  ;;  %v526_v15 = vmul.f32 %v1863_v52, %v519_v62  ;;  %v527_v16 = vmul.f32 %v1863_v52, %v520_v9 }
  0xd6   : > { %v981_v36 = vpop.permute.xlu0 %980  ;;  %v531_v37 = vpop.permute.xlu1 %530 }
  0xd7   : > { %v982_v10 = vsel %vm503_vm5, %v979_v14, %v981_v36  ;;  %v983_v58 = vsel %vm503_vm5, %v981_v36, %v979_v14  ;;  %v953_v14 = vadd.f32 %v951_v7, %v1861_v51  ;;  %v974_v36 = vmul.f32 %v972_v12, %v1839_v28 }
  0xd8   : > { %v996_v31 = vmul.f32 %v989_v30, %v982_v10  ;;  %v997_v32 = vmul.f32 %v993_v33, %v983_v58 }
  0xd9   : > { %v976_v56 = vadd.f32 %v974_v36, %v952_v43 }
  0xda   : > { %v533_v4 = vpop.permute.xlu0 %532  ;;  %v1003_v5 = vpop.permute.xlu1 %1002  ;;  %v998_v51 = vmul.f32 %v996_v31, %v1863_v52  ;;  %v999_v46 = vmul.f32 %v997_v32, %v1863_v52 }
  0xdb   : > { %v535_v8 = vsel %vm534_vm6, %v531_v37, %v533_v4  ;;  %v536_v61 = vsel %vm534_vm6, %v533_v4, %v531_v37  ;;  %v975_v37 = vmul.f32 %v973_v3, %v1839_v28 }
  0xdc   : > { %v550_v26 = vmul.f32 %v543_v17, %v535_v8  ;;  %v551_v27 = vmul.f32 %v547_v38, %v536_v61  ;;  %v497_v17 = vadd.f32 %v495_v24, %v466_v59  ;;  %v498_v38 = vadd.f32 %v496_v25, %v467_v11 }
  0xdd   : > { %v977_v60 = vadd.f32 %v975_v37, %v953_v14  ;;  %v1000_v8 = vadd.f32 %v998_v51, %v976_v56 }
  0xde   : > { %v1005_v21 = vpop.permute.xlu0 %1004  ;;  %v562_v29 = vpop.permute.xlu1 %561  ;;  %v557_v41 = vmul.f32 %v1865_v57, %v550_v26  ;;  %v558_v44 = vmul.f32 %v1865_v57, %v551_v27 }
  0xdf   : > { %v1006_v34 = vsel %vm534_vm6, %v1003_v5, %v1005_v21  ;;  %v1007_v42 = vsel %vm534_vm6, %v1005_v21, %v1003_v5  ;;  %v1001_v61 = vadd.f32 %v999_v46, %v977_v60 }
  0xe0   : > { %v1020_v30 = vmul.f32 %v1013_v39, %v1006_v34  ;;  %v1021_v33 = vmul.f32 %v1017_v40, %v1007_v42  ;;  %v528_v39 = vadd.f32 %v526_v15, %v497_v17  ;;  %v529_v40 = vadd.f32 %v527_v16, %v498_v38  ;;  %v311_v42 = vld [vmem:[%s2414_s4] sm:$0xff] }
  0xe1   : > { %v1586_v34 = vmov 2  }
  0xe2   : > { %v564_v45 = vpop.permute.xlu0 %563  ;;  %v595_v50 = vpop.permute.xlu1 %594  ;;  %v1022_v63 = vmul.f32 %v1020_v30, %v1865_v57  ;;  %v1023_v0 = vmul.f32 %v1021_v33, %v1865_v57  ;;  %v559_v1 = vadd.f32 %v557_v41, %v528_v39  ;;  %v560_v4 = vadd.f32 %v558_v44, %v529_v40  ;;  %1487 = vset.pattern.permute.xlu0 %v1586_v34 }
  0xe3   : > { %v566_v54 = vsel %vm565_vm7, %v562_v29, %v564_v45  ;;  %v567_v28 = vsel %vm565_vm7, %v564_v45, %v562_v29 }
  0xe4   : > { %v581_v20 = vmul.f32 %v574_v47, %v566_v54  ;;  %v582_v55 = vmul.f32 %v578_v48, %v567_v28  ;;  %v1024_v58 = vadd.f32 %v1022_v63, %v1000_v8  ;;  %v1025_v59 = vadd.f32 %v1023_v0, %v1001_v61 }
  0xe6   : > { %v588_v52 = vmul.f32 %v1901_v13, %v581_v20  ;;  %v589_v5 = vmul.f32 %v1901_v13, %v582_v55  ;;  %v1027_v6 = vpop.permute.xlu0 %1026  ;;  %v1029_v7 = vpop.permute.xlu1 %1028 }
  0xe7   : > { %v1030_v47 = vsel %vm565_vm7, %v1027_v6, %v1029_v7  ;;  %v1031_v48 = vsel %vm565_vm7, %v1029_v7, %v1027_v6 }
  0xe8   : > { %v590_v62 = vadd.f32 %v588_v52, %v559_v1  ;;  %v591_v9 = vadd.f32 %v589_v5, %v560_v4  ;;  %v1044_v57 = vmul.f32 %v1037_v49, %v1030_v47  ;;  %v1045_v10 = vmul.f32 %v1041_v53, %v1031_v48 }
  0xea   : > { %v2012_v11 = vadd.f32 %v595_v50, %v590_v62  ;;  %v2014_v12 = vadd.f32 %v595_v50, %v591_v9  ;;  %v1046_v3 = vmul.f32 %v1044_v57, %v1901_v13  ;;  %v1047_v19 = vmul.f32 %v1045_v10, %v1901_v13  ;;  %v310_v9 = vld [vmem:[%s2413_s3] sm:$0x1] }
  0xec   : > { %v1048_v24 = vadd.f32 %v1046_v3, %v1024_v58  ;;  %v1049_v25 = vadd.f32 %v1047_v19, %v1025_v59  ;;  %v599_v26 = vadd.f32 %v2014_v12, %v2012_v11  ;;  %v602_v49 = vmul.f32 %v2012_v11, %v2012_v11  ;;  %v312_v3 = vld [vmem:[%s2415_s5] sm:$0xff] }
  0xed   : > { %v603_v35 = vmul.f32 %v2014_v12, %v2014_v12 }
  0xee   : > { %v2024_v53 = vadd.f32 %v1048_v24, %v595_v50  ;;  %v2026_v27 = vadd.f32 %v1049_v25, %v595_v50  ;;  %600 = vadd.xlane.f32.xlu0 %v599_v26 }
  0xef   : > { %v604_v21 = vadd.f32 %v603_v35, %v602_v49  ;;  %v313_v49 = vld [vmem:[%s2415_s5 + $0x8] sm:$0xff] }
  0xf0   : > { %v1052_v13 = vadd.f32 %v2026_v27, %v2024_v53  ;;  %v1055_v29 = vmul.f32 %v2024_v53, %v2024_v53  ;;  %v1056_v31 = vmul.f32 %v2026_v27, %v2026_v27 }
  0xf2   : > { %1053 = vadd.xlane.f32.xlu1 %v1052_v13  ;;  %605 = vadd.xlane.f32.xlu0 %v604_v21  ;;  %v1057_v32 = vadd.f32 %v1056_v31, %v1055_v29  ;;  %v1587_v13 = vmov 1  }
  0xf6   : > { %1058 = vadd.xlane.f32.xlu0 %v1057_v32 }
 0x17b   : > { %v601_v43 = vpop.xlane.xlu0 %600 }
 0x17c   : > { %v607_v14 = vmul.f32 %v601_v43, %v311_v42 }
 0x17e   : > { %v609_v15 = vsel %vm608_vm8, %v607_v14, 0.0 }
 0x17f   : > { %v610_v16 = vrot.slane %v609_v15, 4  ;;  %v1054_v36 = vpop.xlane.xlu1 %1053  ;;  %v606_v37 = vpop.xlane.xlu0 %605 }
 0x180   : > { %v1060_v30 = vmul.f32 %v1054_v36, %v311_v42  ;;  %v616_v33 = vmul.f32 %v606_v37, %v311_v42 }
 0x181   : > { %v611_v17 = vadd.f32 %v610_v16, %v609_v15 }
 0x182   : > { %v617_v38 = vsel %vm608_vm8, %v616_v33, 0.0  ;;  %v1061_v50 = vsel %vm608_vm8, %v1060_v30, 0.0 }
 0x183   : > { %v612_v41 = vrot.slane %v611_v17, 2  ;;  %v618_v44 = vrot.slane %v617_v38, 4  ;;  %v1059_v45 = vpop.xlane.xlu0 %1058  ;;  %v1062_v40 = vrot.slane %v1061_v50, 4 }
 0x184   : > { %v1068_v51 = vmul.f32 %v1059_v45, %v311_v42  ;;  %v1591_v45 = vmov 5  }
 0x185   : > { %v613_v46 = vadd.f32 %v612_v41, %v611_v17  ;;  %v619_v54 = vadd.f32 %v618_v44, %v617_v38  ;;  %v1063_v63 = vadd.f32 %v1062_v40, %v1061_v50  ;;  %v1588_v38 = vmov 3  }
 0x186   : > { %v1069_v28 = vsel %vm608_vm8, %v1068_v51, 0.0  ;;  %v1589_v41 = vmov 4   ;;  %v1590_v44 = vmov 6   ;;  %v2099_v50 = vsub.s32 2, %v1770_v18 }
 0x187   : > { %v614_v39 = vrot.slane %v613_v46, 1  ;;  %v620_v20 = vrot.slane %v619_v54, 2  ;;  %v1070_v60 = vrot.slane %v1069_v28, 4  ;;  %v1064_v5 = vrot.slane %v1063_v63, 2 }
 0x188   : > { %v2104_v51 = vrot.slane %v2012_v11, %v1777_v22 }
 0x189   : > { %v615_v55 = vadd.f32 %v614_v39, %v613_v46  ;;  %v621_v56 = vadd.f32 %v620_v20, %v619_v54  ;;  %v1071_v52 = vadd.f32 %v1070_v60, %v1069_v28  ;;  %v1065_v61 = vadd.f32 %v1064_v5, %v1063_v63  ;;  %v315_v5 = vld [vmem:[%s2416_s6 + $0x8] sm:$0xff] }
 0x18a   : > { %v716_v46 = vrot.slane %v2012_v11, %v2099_v50  ;;  %v720_v54 = vrot.slane %v2014_v12, %v2099_v50  ;;  %v2127_v60 = vrot.slane %v2012_v11, %v1780_v23  ;;  %v2131_v63 = vrot.slane %v2014_v12, %v1780_v23 }
 0x18b   : > { %v622_v0 = vrot.slane %v621_v56, 1  ;;  %v624_v1 = vmul.f32 %v615_v55, %v615_v55  ;;  %v1072_v8 = vrot.slane %v1071_v52, 2  ;;  %v1066_v48 = vrot.slane %v1065_v61, 1 }
 0x18d   : > { %v623_v4 = vadd.f32 %v622_v0, %v621_v56  ;;  %v1073_v47 = vadd.f32 %v1072_v8, %v1071_v52  ;;  %v1067_v57 = vadd.f32 %v1066_v48, %v1065_v61  ;;  %v314_v8 = vld [vmem:[%s2416_s6] sm:$0xff]  ;;  %v1592_v48 = vmov 7  }
 0x18f   : > { %v625_v6 = vsub.f32 %v623_v4, %v624_v1  ;;  %v1074_v62 = vrot.slane %v1073_v47, 1  ;;  %v1076_v19 = vmul.f32 %v1067_v57, %v1067_v57 }
 0x191   : > { %v626_v7 = vadd.f32 1e-05, %v625_v6  ;;  %v1075_v58 = vadd.f32 %v1074_v62, %v1073_v47 }
 0x193   : > { %1509 = vrsqrt.f32 %v626_v7  ;;  %v1077_v25 = vsub.f32 %v1075_v58, %v1076_v19 }
 0x195   : > { %v1078_v35 = vadd.f32 1e-05, %v1077_v25 }
 0x197   : > { %1511 = vrsqrt.f32 %v1078_v35 }
 0x19d   : > { %v1510_v10 = vpop.eup %1509 }
 0x19e   : > { %v628_v59 = vmul.f32 %v1510_v10, %v310_v9 }
 0x1a0   : > { %v632_v24 = vrot.slane %v628_v59, %v1777_v22 }
 0x1a1   : > { %v1512_v29 = vpop.eup %1511 }
 0x1a2   : > { %v2049_v26 = vmul.f32 %v632_v24, %v312_v3  ;;  %v2056_v21 = vmul.f32 %v632_v24, %v313_v49  ;;  %v1080_v31 = vmul.f32 %v1512_v29, %v310_v9  ;;  %v739_v9 = vsub.s32 3, %v1770_v18 }
 0x1a3   : > { %v763_v29 = vsub.s32 4, %v1770_v18 }
 0x1a4   : > { %706 = vperm.xlu0 %1487, %v2049_v26   ;;  %647 = vperm.xlu1 %1485, %v2049_v26   ;;  %v1084_v32 = vrot.slane %v1080_v31, %v1777_v22  ;;  %v636_v42 = vmul.f32 %v2056_v21, %v615_v55  ;;  %v635_v37 = vmul.f32 %v2049_v26, %v615_v55 }
 0x1a5   : > { %v744_v19 = vrot.slane %v2014_v12, %v739_v9 }
 0x1a6   : > { %v2062_v43 = vmul.f32 %v1084_v32, %v313_v49  ;;  %v640_v14 = vsel %vm608_vm8, %v636_v42, 0.0  ;;  %v2067_v36 = vmul.f32 %v1084_v32, %v312_v3  ;;  %v637_v30 = vsel %vm608_vm8, %v635_v37, 0.0 }
 0x1a7   : > { %v740_v3 = vrot.slane %v2012_v11, %v739_v9  ;;  %v2173_v32 = vrot.slane %v2012_v11, %v763_v29  ;;  %v2176_v42 = vrot.slane %v2014_v12, %v763_v29 }
 0x1a8   : > { %1486 = vset.pattern.permute.xlu1 %v1587_v13  ;;  %1488 = vset.pattern.permute.xlu0 %v1587_v13  ;;  %v1088_v15 = vmul.f32 %v2062_v43, %v1067_v57  ;;  %v1087_v33 = vmul.f32 %v2067_v36, %v1067_v57 }
 0x1a9   : > { %686 = vperm.xlu1 %1486, %v2056_v21  }
 0x1aa   : > { %v1092_v16 = vsel %vm608_vm8, %v1088_v15, 0.0  ;;  %v1089_v17 = vsel %vm608_vm8, %v1087_v33, 0.0 }
 0x1ad   : > { %1489 = vset.pattern.permute.xlu1 %v1586_v34 }
 0x1c3   : > { %641 = vadd.xlane.f32.xlu0 %v640_v14 }
 0x1c7   : > { %1093 = vadd.xlane.f32.xlu0 %v1092_v16 }
 0x1cd   : > { %638 = vadd.xlane.f32.xlu1 %v637_v30 }
 0x1d1   : > { %1090 = vadd.xlane.f32.xlu1 %v1089_v17 }
 0x1dd   : > { %682 = vperm.xlu0 %1488, %v2049_v26  }
 0x1e1   : > { %1138 = vperm.xlu0 %1488, %v2062_v43  }
 0x1e2   : > { %710 = vperm.xlu1 %1489, %v2056_v21  }
 0x1e5   : > { %1497 = vset.pattern.permute.xlu0 %v1588_v38 }
 0x1e6   : > { %1182 = vperm.xlu0 %1497, %v2067_v36   ;;  %1490 = vset.pattern.permute.xlu1 %v1588_v38 }
 0x1e7   : > { %730 = vperm.xlu1 %1490, %v2049_v26  }
 0x1ea   : > { %1500 = vset.pattern.permute.xlu0 %v1589_v41 }
 0x1eb   : > { %1210 = vperm.xlu0 %1500, %v2062_v43   ;;  %734 = vperm.xlu1 %1490, %v2056_v21  }
 0x1ef   : > { %1502 = vset.pattern.permute.xlu0 %v1590_v44  ;;  %1491 = vset.pattern.permute.xlu1 %v1589_v41 }
 0x1f0   : > { %806 = vperm.xlu0 %1502, %v2056_v21   ;;  %754 = vperm.xlu1 %1491, %v2049_v26  }
 0x1f4   : > { %1503 = vset.pattern.permute.xlu0 %v1577_v2  ;;  %758 = vperm.xlu1 %1491, %v2056_v21  }
 0x1f5   : > { %652 = vperm.xlu0 %1503, %v2056_v21  }
 0x1f8   : > { %1492 = vset.pattern.permute.xlu1 %v1591_v45 }
 0x1f9   : > { %1099 = vperm.xlu0 %1503, %v2067_v36   ;;  %778 = vperm.xlu1 %1492, %v2049_v26  }
 0x1fd   : > { %782 = vperm.xlu1 %1492, %v2056_v21  }
 0x201   : > { %1493 = vset.pattern.permute.xlu1 %v1590_v44 }
 0x202   : > { %802 = vperm.xlu1 %1493, %v2049_v26  }
 0x206   : > { %1494 = vset.pattern.permute.xlu1 %v1577_v2 }
 0x207   : > { %1104 = vperm.xlu1 %1494, %v2062_v43  }
 0x20b   : > { %1495 = vset.pattern.permute.xlu1 %v1587_v13 }
 0x20c   : > { %1134 = vperm.xlu1 %1495, %v2067_v36  }
 0x210   : > { %1496 = vset.pattern.permute.xlu1 %v1586_v34  ;;  %v2108_v34 = vrot.slane %v2014_v12, %v1777_v22 }
 0x211   : > { %1158 = vperm.xlu1 %1496, %v2067_v36  }
 0x215   : > { %1162 = vperm.xlu1 %1496, %v2062_v43  }
 0x219   : > { %1498 = vset.pattern.permute.xlu1 %v1588_v38 }
 0x21a   : > { %1186 = vperm.xlu1 %1498, %v2062_v43  }
 0x21e   : > { %1499 = vset.pattern.permute.xlu1 %v1589_v41 }
 0x21f   : > { %1206 = vperm.xlu1 %1499, %v2067_v36  }
 0x223   : > { %v648_v28 = vpop.permute.xlu1 %647  ;;  %1501 = vset.pattern.permute.xlu1 %v1591_v45  ;;  %v707_v39 = vpop.permute.xlu0 %706 }
 0x224   : > { %v2115_v40 = vmul.f32 %v2104_v51, %v648_v28  ;;  %v2118_v20 = vmul.f32 %v2108_v34, %v648_v28  ;;  %v2120_v55 = vmul.f32 %v716_v46, %v707_v39  ;;  %v2122_v56 = vmul.f32 %v720_v54, %v707_v39  ;;  %1230 = vperm.xlu1 %1501, %v2067_v36  }
 0x228   : > { %v687_v0 = vpop.permute.xlu1 %686  ;;  %1234 = vperm.xlu1 %1501, %v2062_v43  }
 0x229   : > { %v2135_v1 = vmul.f32 %v2127_v60, %v687_v0  ;;  %v2138_v4 = vmul.f32 %v2131_v63, %v687_v0 }
 0x22c   : > { %1504 = vset.pattern.permute.xlu1 %v1590_v44 }
 0x22d   : > { %1254 = vperm.xlu1 %1504, %v2067_v36  }
 0x231   : > { %1505 = vset.pattern.permute.xlu1 %v1577_v2 }
 0x250   : > { %v642_v52 = vpop.xlane.xlu0 %641 }
 0x251   : > { %v644_v62 = vsub.f32 %v315_v5, %v642_v52  ;;  %v811_v52 = vsub.s32 6, %v1770_v18 }
 0x254   : > { %v1094_v6 = vpop.xlane.xlu0 %1093 }
 0x255   : > { %v1096_v7 = vsub.f32 %v315_v5, %v1094_v6  ;;  %v787_v5 = vsub.s32 5, %v1770_v18  ;;  %v2205_v6 = vrot.slane %v2024_v53, %v1780_v23 }
 0x257   : > { %1126 = vperm.xlu0 %1503, %v1096_v7   ;;  %v2209_v7 = vrot.slane %v2026_v27, %v1780_v23  ;;  %v792_v23 = vrot.slane %v2014_v12, %v787_v5 }
 0x25a   : > { %v639_v61 = vpop.xlane.xlu1 %638 }
 0x25b   : > { %v643_v47 = vsub.f32 %v314_v8, %v639_v61  ;;  %1507 = vset.pattern.permute.xlu0 %v1592_v48  ;;  %v1192_v61 = vrot.slane %v2024_v53, %v739_v9 }
 0x25c   : > { %826 = vperm.xlu0 %1507, %v2049_v26   ;;  %v683_v33 = vpop.permute.xlu0 %682 }
 0x25d   : > { %669 = vperm.xlu1 %1505, %v643_v47   ;;  %v1196_v47 = vrot.slane %v2026_v27, %v739_v9  ;;  %v1110_v9 = vrot.slane %v2024_v53, %v1777_v22 }
 0x25e   : > { %v1091_v2 = vpop.xlane.xlu1 %1090 }
 0x25f   : > { %v1095_v10 = vsub.f32 %v314_v8, %v1091_v2  ;;  %v835_v8 = vsub.s32 7, %v1770_v18  ;;  %v2218_v2 = vrot.slane %v2026_v27, %v763_v29 }
 0x260   : > { %1282 = vperm.xlu0 %1507, %v2062_v43   ;;  %v1139_v38 = vpop.permute.xlu0 %1138 }
 0x261   : > { %674 = vperm.xlu1 %1505, %v644_v62   ;;  %v812_v62 = vrot.slane %v2012_v11, %v811_v52 }
 0x262   : > { %v711_v57 = vpop.permute.xlu1 %710 }
 0x263   : > { %v2152_v58 = vmul.f32 %v716_v46, %v711_v57  ;;  %v2154_v59 = vmul.f32 %v720_v54, %v711_v57  ;;  %v816_v57 = vrot.slane %v2014_v12, %v811_v52 }
 0x265   : > { %2428 = vst [vmem:[#allocation5_spill] sm:$0xff] %v2152_v58  ;;  %2429 = vst [vmem:[#allocation6_spill] sm:$0xff] %v2154_v59  ;;  %1121 = vperm.xlu1 %1505, %v1095_v10   ;;  %v788_v10 = vrot.slane %v2012_v11, %v787_v5  ;;  %v698_v59 = vmul.f32 %v2131_v63, %v683_v33  ;;  %v2255_v58 = vrot.slane %v2024_v53, %v835_v8 }
 0x266   : > { %v731_v24 = vpop.permute.xlu1 %730 }
 0x267   : > { %v2158_v25 = vmul.f32 %v740_v3, %v731_v24  ;;  %v2160_v26 = vmul.f32 %v744_v19, %v731_v24  ;;  %v1168_v24 = vrot.slane %v2024_v53, %v2099_v50  ;;  %2438 = vst [vmem:[#allocation15_spill] sm:$0xff] %v2255_v58 }
 0x269   : > { %1506 = vset.pattern.permute.xlu1 %v1590_v44 }
 0x26a   : > { %v735_v49 = vpop.permute.xlu1 %734  ;;  %1258 = vperm.xlu1 %1506, %v2062_v43  }
 0x26b   : > { %v2164_v35 = vmul.f32 %v740_v3, %v735_v49  ;;  %v2166_v13 = vmul.f32 %v744_v19, %v735_v49  ;;  %v1114_v19 = vrot.slane %v2026_v27, %v1777_v22  ;;  %v1172_v49 = vrot.slane %v2026_v27, %v2099_v50 }
 0x26c   : > { %v697_v50 = vmul.f32 %v2127_v60, %v683_v33 }
 0x26d   : > { %2430 = vst [vmem:[#allocation7_spill] sm:$0xff] %v2164_v35  ;;  %2431 = vst [vmem:[#allocation8_spill] sm:$0xff] %v2166_v13  ;;  %v2247_v13 = vrot.slane %v2012_v11, %v835_v8  ;;  %v2250_v35 = vrot.slane %v2014_v12, %v835_v8 }
 0x26e   : > { %1508 = vset.pattern.permute.xlu1 %v1592_v48  ;;  %v2215_v48 = vrot.slane %v2024_v53, %v763_v29  ;;  %v2235_v29 = vrot.slane %v2024_v53, %v787_v5 }
 0x26f   : > { %v2169_v31 = vpop.permute.xlu1 %754  ;;  %830 = vperm.xlu1 %1508, %v2056_v21   ;;  %2437 = vst [vmem:[#allocation14_spill] sm:$0xff] %v2247_v13 }
 0x273   : > { %v759_v14 = vpop.permute.xlu1 %758  ;;  %1278 = vperm.xlu1 %1508, %v2067_v36   ;;  %v1183_v36 = vpop.permute.xlu0 %1182 }
 0x274   : > { %v2180_v43 = vmul.f32 %v2173_v32, %v759_v14  ;;  %v2183_v15 = vmul.f32 %v2176_v42, %v759_v14  ;;  %v2238_v14 = vrot.slane %v2026_v27, %v787_v5  ;;  %v2262_v13 = vmul.f32 %v1192_v61, %v1183_v36 }
 0x275   : > { %v2264_v12 = vmul.f32 %v1196_v47, %v1183_v36 }
 0x276   : > { %2432 = vst [vmem:[#allocation9_spill] sm:$0xff] %v2180_v43  ;;  %2433 = vst [vmem:[#allocation10_spill] sm:$0xff] %v2183_v15  ;;  %v2244_v15 = vrot.slane %v2026_v27, %v811_v52 }
 0x277   : > { %v1211_v45 = vpop.permute.xlu0 %1210  ;;  %2440 = vst [vmem:[#allocation17_spill] sm:$0xff] %v2262_v13  ;;  %2441 = vst [vmem:[#allocation18_spill] sm:$0xff] %v2264_v12 }
 0x278   : > { %v2185_v16 = vpop.permute.xlu1 %778  ;;  %2436 = vst [vmem:[#allocation13_spill] sm:$0xff] %v2244_v15  ;;  %v1223_v60 = vmul.f32 %v2215_v48, %v1211_v45  ;;  %v1224_v63 = vmul.f32 %v2218_v2, %v1211_v45 }
 0x279   : > { %v794_v13 = vmul.f32 %v792_v23, %v2185_v16 }
 0x27b   : > { %v807_v54 = vpop.permute.xlu0 %806 }
 0x27c   : > { %v2187_v37 = vpop.permute.xlu1 %782 }
 0x27f   : > { %v653_v39 = vpop.permute.xlu0 %652 }
 0x280   : > { %v665_v12 = vmul.f32 %v2104_v51, %v653_v39  ;;  %v666_v45 = vmul.f32 %v2108_v34, %v653_v39 }
 0x281   : > { %v2189_v21 = vpop.permute.xlu1 %802 }
 0x282   : > { %v817_v39 = vmul.f32 %v812_v62, %v2189_v21 }
 0x283   : > { %v1100_v3 = vpop.permute.xlu0 %1099 }
 0x286   : > { %v1105_v30 = vpop.permute.xlu1 %1104 }
 0x287   : > { %v1117_v43 = vmul.f32 %v1110_v9, %v1105_v30  ;;  %v1118_v22 = vmul.f32 %v1114_v19, %v1105_v30  ;;  %v1152_v30 = vmul.f32 %v2209_v7, %v1139_v38 }
 0x28b   : > { %v2191_v17 = vpop.permute.xlu1 %1134 }
 0x290   : > { %v2193_v41 = vpop.permute.xlu1 %1158 }
 0x294   : > { %v1163_v44 = vpop.permute.xlu1 %1162 }
 0x295   : > { %v1175_v36 = vmul.f32 %v1168_v24, %v1163_v44 }
 0x299   : > { %v2195_v46 = vpop.permute.xlu1 %1186 }
 0x29e   : > { %v2197_v28 = vpop.permute.xlu1 %1206 }
 0x2a3   : > { %v2199_v0 = vpop.permute.xlu1 %1230 }
 0x2a4   : > { %2434 = vst [vmem:[#allocation11_spill] sm:$0xff] %v2199_v0  ;;  %v2241_v0 = vrot.slane %v2024_v53, %v811_v52  ;;  %v1151_v52 = vmul.f32 %v2205_v6, %v1139_v38  ;;  %v769_v53 = vmul.f32 %v2173_v32, %v2169_v31  ;;  %v1115_v32 = vmul.f32 %v1110_v9, %v1100_v3 }
 0x2a5   : > { %v1200_v9 = vmul.f32 %v1196_v47, %v2195_v46 }
 0x2a6   : > { %2435 = vst [vmem:[#allocation12_spill] sm:$0xff] %v2241_v0  ;;  %v2258_v0 = vrot.slane %v2026_v27, %v835_v8  ;;  %v770_v27 = vmul.f32 %v2176_v42, %v2169_v31 }
 0x2a7   : > { %v2224_v18 = vpop.permute.xlu1 %1234 }
 0x2a8   : > { %2439 = vst [vmem:[#allocation16_spill] sm:$0xff] %v2258_v0  ;;  %v1116_v0 = vmul.f32 %v1114_v19, %v1100_v3  ;;  %v1199_v3 = vmul.f32 %v1192_v61, %v2195_v46 }
 0x2ac   : > { %v2268_v33 = vpop.permute.xlu1 %1254 }
 0x2ad   : > { %2442 = vst [vmem:[#allocation19_spill] sm:$0xff] %v2268_v33  ;;  %v793_v33 = vmul.f32 %v788_v10, %v2185_v16  ;;  %v818_v16 = vmul.f32 %v816_v57, %v2189_v21 }
 0x2d6   : > { %v1127_v5 = vpop.permute.xlu0 %1126 }
 0x2d7   : > { %v1131_v11 = vadd.f32 %v1127_v5, %v1117_v43  ;;  %v1132_v15 = vadd.f32 %v1127_v5, %v1118_v22  ;;  %v2274_v43 = vmul.f32 %v812_v62, %v807_v54  ;;  %v2276_v22 = vmul.f32 %v816_v57, %v807_v54 }
 0x2d8   : > { %v1176_v5 = vmul.f32 %v1172_v49, %v1163_v44  ;;  %v2286_v54 = vmul.f32 %v792_v23, %v2187_v37 }
 0x2d9   : > { %v1155_v8 = vadd.f32 %v1151_v52, %v1131_v11  ;;  %v1156_v38 = vadd.f32 %v1152_v30, %v1132_v15  ;;  %v2283_v15 = vmul.f32 %v788_v10, %v2187_v37  ;;  %v1149_v10 = vmul.f32 %v2205_v6, %v2191_v17 }
 0x2da   : > { %v1150_v37 = vmul.f32 %v2209_v7, %v2191_v17  ;;  %v1221_v6 = vmul.f32 %v2215_v48, %v2197_v28  ;;  %v1247_v17 = vmul.f32 %v2235_v29, %v2224_v18  ;;  %v2443_v48 = vld [vmem:[#allocation14_spill] sm:$0xff] }
 0x2db   : > { %v1179_v58 = vadd.f32 %v1175_v36, %v1155_v8  ;;  %v1180_v31 = vadd.f32 %v1176_v5, %v1156_v38  ;;  %v827_v44 = vpop.permute.xlu0 %826  ;;  %v2445_v8 = vld [vmem:[#allocation6_spill] sm:$0xff]  ;;  %v2446_v38 = vld [vmem:[#allocation15_spill] sm:$0xff] }
 0x2dc   : > { %v670_v42 = vpop.permute.xlu1 %669 }
 0x2dd   : > { %v677_v51 = vadd.f32 %v670_v42, %v2115_v40  ;;  %v678_v34 = vadd.f32 %v670_v42, %v2118_v20  ;;  %v1173_v40 = vmul.f32 %v1168_v24, %v2193_v41  ;;  %v1174_v20 = vmul.f32 %v1172_v49, %v2193_v41 }
 0x2de   : > { %v1203_v52 = vadd.f32 %v1199_v3, %v1179_v58  ;;  %v1204_v62 = vadd.f32 %v1200_v9, %v1180_v31  ;;  %v1248_v58 = vmul.f32 %v2238_v14, %v2224_v18  ;;  %v841_v24 = vmul.f32 %v2443_v48, %v827_v44 }
 0x2df   : > { %v701_v23 = vadd.f32 %v697_v50, %v677_v51  ;;  %v702_v19 = vadd.f32 %v698_v59, %v678_v34  ;;  %v1222_v59 = vmul.f32 %v2218_v2, %v2197_v28  ;;  %v1283_v7 = vpop.permute.xlu0 %1282  ;;  %v842_v28 = vmul.f32 %v2250_v35, %v827_v44  ;;  %v2448_v44 = vld [vmem:[#allocation7_spill] sm:$0xff] }
 0x2e0   : > { %v675_v30 = vpop.permute.xlu1 %674  ;;  %v1227_v49 = vadd.f32 %v1223_v60, %v1203_v52  ;;  %v1228_v50 = vadd.f32 %v1224_v63, %v1204_v62  ;;  %v1295_v36 = vmul.f32 %v2446_v38, %v1283_v7  ;;  %v2449_v60 = vld [vmem:[#allocation8_spill] sm:$0xff]  ;;  %v2450_v52 = vld [vmem:[#allocation9_spill] sm:$0xff] }
 0x2e1   : > { %v725_v21 = vadd.f32 %v2120_v55, %v701_v23  ;;  %v726_v46 = vadd.f32 %v2122_v56, %v702_v19  ;;  %v679_v61 = vadd.f32 %v675_v30, %v665_v12  ;;  %v680_v47 = vadd.f32 %v675_v30, %v666_v45  ;;  %v2444_v12 = vld [vmem:[#allocation5_spill] sm:$0xff]  ;;  %v2451_v30 = vld [vmem:[#allocation10_spill] sm:$0xff] }
 0x2e2   : > { %v1251_v34 = vadd.f32 %v1247_v17, %v1227_v49  ;;  %v1252_v3 = vadd.f32 %v1248_v58, %v1228_v50  ;;  %v2454_v17 = vld [vmem:[#allocation17_spill] sm:$0xff] }
 0x2e3   : > { %v749_v41 = vadd.f32 %v2158_v25, %v725_v21  ;;  %v750_v55 = vadd.f32 %v2160_v26, %v726_v46  ;;  %v703_v56 = vadd.f32 %v2135_v1, %v679_v61  ;;  %v704_v57 = vadd.f32 %v2138_v4, %v680_v47  ;;  %v2447_v1 = vld [vmem:[#allocation16_spill] sm:$0xff] }
 0x2e4   : > { %v1122_v2 = vpop.permute.xlu1 %1121  ;;  %v1296_v5 = vmul.f32 %v2447_v1, %v1283_v7  ;;  %v2452_v46 = vld [vmem:[#allocation12_spill] sm:$0xff] }
 0x2e5   : > { %v773_v11 = vadd.f32 %v769_v53, %v749_v41  ;;  %v774_v18 = vadd.f32 %v770_v27, %v750_v55  ;;  %v727_v25 = vadd.f32 %v2444_v12, %v703_v56  ;;  %v728_v26 = vadd.f32 %v2445_v8, %v704_v57  ;;  %v2456_v56 = vld [vmem:[#allocation11_spill] sm:$0xff] }
 0x2e6   : > { %v1129_v45 = vadd.f32 %v1122_v2, %v1115_v32  ;;  %v1130_v4 = vadd.f32 %v1122_v2, %v1116_v0 }
 0x2e7   : > { %v797_v31 = vadd.f32 %v793_v33, %v773_v11  ;;  %v798_v42 = vadd.f32 %v794_v13, %v774_v18  ;;  %v751_v51 = vadd.f32 %v2448_v44, %v727_v25  ;;  %v752_v63 = vadd.f32 %v2449_v60, %v728_v26  ;;  %v2453_v13 = vld [vmem:[#allocation13_spill] sm:$0xff] }
 0x2e8   : > { %v1153_v53 = vadd.f32 %v1149_v10, %v1129_v45  ;;  %v1154_v27 = vadd.f32 %v1150_v37, %v1130_v4 }
 0x2e9   : > { %v821_v9 = vadd.f32 %v817_v39, %v797_v31  ;;  %v822_v23 = vadd.f32 %v818_v16, %v798_v42  ;;  %v1259_v19 = vpop.permute.xlu1 %1258  ;;  %v775_v62 = vadd.f32 %v2450_v52, %v751_v51  ;;  %v776_v32 = vadd.f32 %v2451_v30, %v752_v63  ;;  %v2455_v16 = vld [vmem:[#allocation18_spill] sm:$0xff] }
 0x2ea   : > { %v1177_v0 = vadd.f32 %v1173_v40, %v1153_v53  ;;  %v1178_v21 = vadd.f32 %v1174_v20, %v1154_v27  ;;  %v1271_v33 = vmul.f32 %v2452_v46, %v1259_v19  ;;  %v1272_v61 = vmul.f32 %v2453_v13, %v1259_v19 }
 0x2eb   : > { %v845_v47 = vadd.f32 %v841_v24, %v821_v9  ;;  %v846_v41 = vadd.f32 %v842_v28, %v822_v23  ;;  %v799_v10 = vadd.f32 %v2283_v15, %v775_v62  ;;  %v800_v37 = vadd.f32 %v2286_v54, %v776_v32 }
 0x2ec   : > { %v1201_v39 = vadd.f32 %v2454_v17, %v1177_v0  ;;  %v1202_v58 = vadd.f32 %v2455_v16, %v1178_v21  ;;  %v1275_v55 = vadd.f32 %v1271_v33, %v1251_v34  ;;  %v1276_v7 = vadd.f32 %v1272_v61, %v1252_v3 }
 0x2ed   : > { %v1245_v40 = vmul.f32 %v2235_v29, %v2456_v56  ;;  %v1246_v20 = vmul.f32 %v2238_v14, %v2456_v56  ;;  %849 = vst [vmem:[%s2337_s23] sm:$0xff] %v845_v47  ;;  %850 = vst [vmem:[%s2337_s23 + $0x8] sm:$0xff] %v846_v41  ;;  %v823_v15 = vadd.f32 %v2274_v43, %v799_v10  ;;  %v2457_v43 = vld [vmem:[#allocation19_spill] sm:$0xff] }
 0x2ee   : > { %v824_v54 = vadd.f32 %v2276_v22, %v800_v37  ;;  %v1299_v57 = vadd.f32 %v1295_v36, %v1275_v55  ;;  %v1300_v24 = vadd.f32 %v1296_v5, %v1276_v7  ;;  %v831_v29 = vpop.permute.xlu1 %830  ;;  %v1225_v28 = vadd.f32 %v1221_v6, %v1201_v39 }
 0x2ef   : > { %v1226_v14 = vadd.f32 %v1222_v59, %v1202_v58  ;;  %v843_v2 = vmul.f32 %v2443_v48, %v831_v29  ;;  %v844_v49 = vmul.f32 %v2250_v35, %v831_v29  ;;  %v1269_v22 = vmul.f32 %v2452_v46, %v2457_v43 }
 0x2f0   : > { %1417 = vst [vmem:[%s2337_s23 + $0x30] sm:$0xff] %v1299_v57  ;;  %1418 = vst [vmem:[%s2337_s23 + $0x38] sm:$0xff] %v1300_v24  ;;  %v1249_v50 = vadd.f32 %v1245_v40, %v1225_v28  ;;  %v1270_v18 = vmul.f32 %v2453_v13, %v2457_v43 }
 0x2f1   : > { %v1250_v11 = vadd.f32 %v1246_v20, %v1226_v14  ;;  %v847_v12 = vadd.f32 %v843_v2, %v823_v15  ;;  %v848_v6 = vadd.f32 %v844_v49, %v824_v54 }
 0x2f2   : > { %v1279_v59 = vpop.permute.xlu1 %1278  ;;  %v1273_v35 = vadd.f32 %v1269_v22, %v1249_v50 }
 0x2f3   : > { %851 = vst [vmem:[%s2337_s23 + $0x10] sm:$0xff] %v847_v12  ;;  %852 = vst [vmem:[%s2337_s23 + $0x18] sm:$0xff] %v848_v6  ;;  %v1274_v48 = vadd.f32 %v1270_v18, %v1250_v11  ;;  %v1293_v25 = vmul.f32 %v2446_v38, %v1279_v59  ;;  %v1294_v8 = vmul.f32 %v2447_v1, %v1279_v59 }
 0x2f5   : > { %v1297_v26 = vadd.f32 %v1293_v25, %v1273_v35  ;;  %v1298_v36 = vadd.f32 %v1294_v8, %v1274_v48 }
 0x2f7   : > { %1415 = vst [vmem:[%s2337_s23 + $0x20] sm:$0xff] %v1297_v26  ;;  %1416 = vst [vmem:[%s2337_s23 + $0x28] sm:$0xff] %v1298_v36 }
 0x2f8   : > { %1526 = shalt.err (!%p1523_p3)
}
 0x2f9   : > { %s1527_s21 = scalar_lea.hbm %s2360_s12, 1024  ;;  %s1531_s24 = scalar_lea.hbm %s2418_s8, 2048 }
 0x2fa   : > { %p1528_p4 = scmp.ne.s32.totalorder %s2360_s12, %s1527_s21  ;;  %p1532_p9 = scmp.lt.u32.totalorder %s2360_s12, %s2418_s8 }
 0x2fb   : > { %p1533_p10 = scmp.lt.u32.totalorder %s1531_s24, %s1527_s21  ;;  %p1535_p12 = scmp.lt.u32.totalorder %s1527_s21, %s2360_s12 }
 0x2fc   : > { %p1529_p7 = pnand %p1528_p4, %p1678_p5 }
 0x2fd   : > { %p1534_p11 = por %p1533_p10, %p1532_p9 }
 0x2fe   : > { %p1530_p8 = pneg %p1529_p7 }
 0x2ff   : > { %p1536_p13 = por %p1535_p12, %p1534_p11 }
 0x301   : > { %p1537_p0 = pnand %p1536_p13, %p1530_p8 }
 0x303   : > { %1540 = shalt.err (!%p1537_p0)
}
 0x304   : > { %s1594_s13 = smov 256  }
 0x305   : > { %1428 = dma.vmem_to_hbm [thread:$0]  (%p1678_p5), %s2362_s25, 1024, %s2360_s12, %s2368_s9, %s1594_s13, %s1594_s13, %s1579_s18  }
 0x306 PF: > { %p1434_p1 = scmp.ge.s32.totalorder %s1575_s30, 2  ;;  %s1336_s17 = sand.u32 1, %s1563_s27  }
 0x307   : > { %s1337_s19 = scalar_lea.sflag [#allocation3], %s1336_s17 }
 0x308   : > { %p1431_p2 = pnand %p1434_p1, %p1682_p6 }
 0x30a   : > { %1558 = dma.done.wait (!%p1431_p2), %s1337_s19, 1024  }
 0x30b   : > { %1560 = vsyncadd (!%p1431_p2), %s1337_s19, 4294966272  ;;  %p18_p3 = scmp.ge.s32.totalorder %s1665_s11, 4   ;;  %s2458_s27 = smov %s1567_s28 }
 0x30c   : > { %s2459_s28 = smov %s1571_s29  ;;  %s2460_s29 = smov %s1676_s14 }
 0x30d   : > { %s2461_s30 = smov %s1665_s11  ;;  %20 = sbr.rel (!%p18_p3) target bundleno = 3 (0x3), region = 104 }
 0x314   :  { %1342 = vsyncpa [#allocation3], 1 }
 0x315   :  { %1344 = vsyncpa [#allocation3 + $0x1], 1 }

</bundles_post_ra>
